<compile_context>
chip_gen: v6e
topology: v6e:2x2x1
jax: 0.10.0
libtpu: 0.0.40
codegen_flags: <defaults>
</compile_context>

<pallas_src>
import jax
import jax.numpy as jnp
from jax.experimental import pallas as pl
from jax.experimental.pallas import tpu as pltpu


IN_FEATURES = 28 * 28       # 784
IN_PAD = 896                # 7 * 128, lane-dense padded input width
HIDDEN = 512
OUT_FEATURES = 10
OUT_PAD = 128               # lane-dense padded output width
MAX_TM = 256                # batch tile for large batches


def mlp_kernel(x_ref, w1_ref, b1_ref, w2_ref, b2_ref, w3_ref, b3_ref, o_ref):
    """Fused forward pass for one batch tile.

    x_ref : (TM, 896)   bfloat16 (cols 784..895 are zero)
    w1    : (896, 512)  bfloat16 (rows 784..895 are zero),  b1: (1, 512) float32
    w2    : (512, 512)  bfloat16,                            b2: (1, 512) float32
    w3    : (512, 128)  bfloat16 (cols 10..127 zero),        b3: (1, 128) float32
    o_ref : (TM, 128)   float32 (cols 10..127 junk; sliced off outside)
    """
    x = x_ref[...]  # bf16

    # Layer 1: MXU matmul (bf16 in, f32 accumulate); bias + ReLU in f32.
    h1 = jnp.dot(x, w1_ref[...], preferred_element_type=jnp.float32)
    h1 = jnp.maximum(h1 + b1_ref[...], 0.0)
    h1 = h1.astype(jnp.bfloat16)

    # Layer 2
    h2 = jnp.dot(h1, w2_ref[...], preferred_element_type=jnp.float32)
    h2 = jnp.maximum(h2 + b2_ref[...], 0.0)
    h2 = h2.astype(jnp.bfloat16)

    # Layer 3 (logits, padded to 128 lanes for an unmasked, lane-dense store)
    o = jnp.dot(h2, w3_ref[...], preferred_element_type=jnp.float32) + b3_ref[...]
    o_ref[...] = o.astype(o_ref.dtype)


def mlp_forward(x_nchw, params):
    """x_nchw: (B, 1, 28, 28) float -> logits (B, 10) float32."""
    w1, b1, w2, b2, w3, b3 = params
    B = x_nchw.shape[0]

    # nn.Flatten(): flatten all dims after batch (row-major, matches torch).
    x = x_nchw.reshape(B, -1).astype(jnp.bfloat16)
    assert x.shape[1] == IN_FEATURES

    # Batch tiling: pad B to a multiple of 8 (sublane); for large batches, to a
    # multiple of MAX_TM so the grid pipelines / megacore-shards.
    if B <= MAX_TM:
        b_pad = max(8, ((B + 7) // 8) * 8)
        tm = b_pad
    else:
        tm = MAX_TM
        b_pad = ((B + tm - 1) // tm) * tm
    num_tiles = b_pad // tm

    # Zero-pad: batch rows (sublane), input features 784->896 (lane-dense),
    # last-layer columns 10->128 (lane-dense store). Zeros don't change results.
    x = jnp.pad(x, ((0, b_pad - B), (0, IN_PAD - IN_FEATURES)))

    w1p = jnp.pad(w1, ((0, IN_PAD - IN_FEATURES), (0, 0))).astype(jnp.bfloat16)
    w2b = w2.astype(jnp.bfloat16)
    w3p = jnp.pad(w3, ((0, 0), (0, OUT_PAD - OUT_FEATURES))).astype(jnp.bfloat16)
    b1f = b1.astype(jnp.float32)
    b2f = b2.astype(jnp.float32)
    b3p = jnp.pad(b3, ((0, 0), (0, OUT_PAD - OUT_FEATURES))).astype(jnp.float32)

    # Weights stay VMEM-resident across batch tiles (constant block index).
    resident = lambda shape: pl.BlockSpec(shape, lambda i: (0, 0))

    out = pl.pallas_call(
        mlp_kernel,
        out_shape=jax.ShapeDtypeStruct((b_pad, OUT_PAD), jnp.float32),
        grid=(num_tiles,),
        in_specs=[
            pl.BlockSpec((tm, IN_PAD), lambda i: (i, 0)),   # x: tiled on batch
            resident((IN_PAD, HIDDEN)),                     # w1 (row-padded)
            resident((1, HIDDEN)),                          # b1
            resident((HIDDEN, HIDDEN)),                     # w2
            resident((1, HIDDEN)),                          # b2
            resident((HIDDEN, OUT_PAD)),                    # w3 (col-padded)
            resident((1, OUT_PAD)),                         # b3 (padded)
        ],
        out_specs=pl.BlockSpec((tm, OUT_PAD), lambda i: (i, 0)),
        compiler_params=pltpu.CompilerParams(
            dimension_semantics=("parallel",),
            vmem_limit_bytes=16 << 20,
        ),
    )(x, w1p, b1f, w2b, b2f, w3p, b3p)

    # Strip batch padding and the lane padding on the logits.
    return out[:B, :OUT_FEATURES]


def init_params(key):
    """Deterministic init mimicking torch.nn.Linear default
    (U[-1/sqrt(fan_in), 1/sqrt(fan_in)]). Weights stored transposed relative
    to torch: (in_features, out_features), so the kernel computes x @ W + b."""
    def linear(k, fan_in, fan_out):
        kw, kb = jax.random.split(k)
        bound = 1.0 / jnp.sqrt(jnp.float32(fan_in))
        w = jax.random.uniform(kw, (fan_in, fan_out), jnp.float32, -bound, bound)
        b = jax.random.uniform(kb, (1, fan_out), jnp.float32, -bound, bound)
        return w, b

    k1, k2, k3 = jax.random.split(key, 3)
    w1, b1 = linear(k1, IN_FEATURES, HIDDEN)
    w2, b2 = linear(k2, HIDDEN, HIDDEN)
    w3, b3 = linear(k3, HIDDEN, OUT_FEATURES)
    return (w1, b1, w2, b2, w3, b3)


if __name__ == "__main__":
    key = jax.random.PRNGKey(0)
    k_params, k_x = jax.random.split(key)

    params = init_params(k_params)

    # Small batch of MNIST-like images, NCHW as PyTorch expects.
    B = 8
    x = jax.random.normal(k_x, (B, 1, 28, 28), dtype=jnp.float32)

    logits = mlp_forward(x, params)
    logits = jax.block_until_ready(logits)

    # Reference in plain JAX with the same bf16 weight/activation casts as the
    # kernel (f32 accumulation), so only accumulation-order noise differs.
    w1, b1, w2, b2, w3, b3 = params
    xf = x.reshape(B, -1).astype(jnp.bfloat16)
    h = jnp.dot(xf, w1.astype(jnp.bfloat16), preferred_element_type=jnp.float32)
    h = jnp.maximum(h + b1, 0.0).astype(jnp.bfloat16)
    h = jnp.dot(h, w2.astype(jnp.bfloat16), preferred_element_type=jnp.float32)
    h = jnp.maximum(h + b2, 0.0).astype(jnp.bfloat16)
    ref = jnp.dot(h, w3.astype(jnp.bfloat16), preferred_element_type=jnp.float32) + b3

    assert logits.shape == (B, OUT_FEATURES), logits.shape
    assert jnp.allclose(logits, ref, atol=1e-2, rtol=1e-2), "mismatch vs reference"

    print("KERNEL_OK")
</pallas_src>

<mosaic_0001>
module attributes {stable_mosaic.version = 11 : i64} {
  func.func @mlp_kernel(%arg0: i32, %arg1: memref<8x896xbf16, #tpu.memory_space<vmem>>, %arg2: memref<896x512xbf16, #tpu.memory_space<vmem>>, %arg3: memref<1x512xf32, #tpu.memory_space<vmem>>, %arg4: memref<512x512xbf16, #tpu.memory_space<vmem>>, %arg5: memref<1x512xf32, #tpu.memory_space<vmem>>, %arg6: memref<512x128xbf16, #tpu.memory_space<vmem>>, %arg7: memref<1x128xf32, #tpu.memory_space<vmem>>, %arg8: memref<8x128xf32, #tpu.memory_space<vmem>>) attributes {dimension_semantics = [#tpu.dimension_semantics<parallel>], iteration_bounds = array<i64: 1>, scalar_prefetch = 0 : i64, scratch_operands = 0 : i64, tpu.core_type = #tpu.core_type<tc>, window_params = [{transform_indices = @transform_0, window_bounds = array<i64: 8, 896>}, {pipeline_mode = #tpu.pipeline_mode<synchronous>, transform_indices = @transform_1, window_bounds = array<i64: 896, 512>}, {pipeline_mode = #tpu.pipeline_mode<synchronous>, transform_indices = @transform_2, window_bounds = array<i64: 1, 512>}, {pipeline_mode = #tpu.pipeline_mode<synchronous>, transform_indices = @transform_3, window_bounds = array<i64: 512, 512>}, {pipeline_mode = #tpu.pipeline_mode<synchronous>, transform_indices = @transform_4, window_bounds = array<i64: 1, 512>}, {pipeline_mode = #tpu.pipeline_mode<synchronous>, transform_indices = @transform_5, window_bounds = array<i64: 512, 128>}, {pipeline_mode = #tpu.pipeline_mode<synchronous>, transform_indices = @transform_6, window_bounds = array<i64: 1, 128>}, {transform_indices = @transform_7, window_bounds = array<i64: 8, 128>}]} {
    %c0 = arith.constant 0 : index
    %c0_0 = arith.constant 0 : index
    %0 = vector.load %arg1[%c0, %c0_0] : memref<8x896xbf16, #tpu.memory_space<vmem>>, vector<8x896xbf16>
    %c0_1 = arith.constant 0 : index
    %c0_2 = arith.constant 0 : index
    %1 = vector.load %arg2[%c0_1, %c0_2] : memref<896x512xbf16, #tpu.memory_space<vmem>>, vector<896x512xbf16>
    %cst = arith.constant dense<0.000000e+00> : vector<8x512xf32>
    %2 = tpu.matmul %0, %1, %cst {dimension_numbers = #tpu.dot_dimension_numbers<[1], [0], [0], [1], [0, 0, 1, 1], [], []>} : vector<8x896xbf16>, vector<896x512xbf16>, vector<8x512xf32> -> vector<8x512xf32>
    %c0_3 = arith.constant 0 : index
    %c0_4 = arith.constant 0 : index
    %3 = vector.load %arg3[%c0_3, %c0_4] : memref<1x512xf32, #tpu.memory_space<vmem>>, vector<1x512xf32>
    %4 = vector.broadcast %3 : vector<1x512xf32> to vector<8x512xf32>
    %5 = arith.addf %2, %4 : vector<8x512xf32>
    %cst_5 = arith.constant 0.000000e+00 : f32
    %6 = vector.broadcast %cst_5 : f32 to vector<8x512xf32>
    %7 = arith.maximumf %5, %6 : vector<8x512xf32>
    %8 = arith.truncf %7 : vector<8x512xf32> to vector<8x512xbf16>
    %c0_6 = arith.constant 0 : index
    %c0_7 = arith.constant 0 : index
    %9 = vector.load %arg4[%c0_6, %c0_7] : memref<512x512xbf16, #tpu.memory_space<vmem>>, vector<512x512xbf16>
    %cst_8 = arith.constant dense<0.000000e+00> : vector<8x512xf32>
    %10 = tpu.matmul %8, %9, %cst_8 {dimension_numbers = #tpu.dot_dimension_numbers<[1], [0], [0], [1], [0, 0, 1, 1], [], []>} : vector<8x512xbf16>, vector<512x512xbf16>, vector<8x512xf32> -> vector<8x512xf32>
    %c0_9 = arith.constant 0 : index
    %c0_10 = arith.constant 0 : index
    %11 = vector.load %arg5[%c0_9, %c0_10] : memref<1x512xf32, #tpu.memory_space<vmem>>, vector<1x512xf32>
    %12 = vector.broadcast %11 : vector<1x512xf32> to vector<8x512xf32>
    %13 = arith.addf %10, %12 : vector<8x512xf32>
    %cst_11 = arith.constant 0.000000e+00 : f32
    %14 = vector.broadcast %cst_11 : f32 to vector<8x512xf32>
    %15 = arith.maximumf %13, %14 : vector<8x512xf32>
    %16 = arith.truncf %15 : vector<8x512xf32> to vector<8x512xbf16>
    %c0_12 = arith.constant 0 : index
    %c0_13 = arith.constant 0 : index
    %17 = vector.load %arg6[%c0_12, %c0_13] : memref<512x128xbf16, #tpu.memory_space<vmem>>, vector<512x128xbf16>
    %cst_14 = arith.constant dense<0.000000e+00> : vector<8x128xf32>
    %18 = tpu.matmul %16, %17, %cst_14 {dimension_numbers = #tpu.dot_dimension_numbers<[1], [0], [0], [1], [0, 0, 1, 1], [], []>} : vector<8x512xbf16>, vector<512x128xbf16>, vector<8x128xf32> -> vector<8x128xf32>
    %c0_15 = arith.constant 0 : index
    %c0_16 = arith.constant 0 : index
    %19 = vector.load %arg7[%c0_15, %c0_16] : memref<1x128xf32, #tpu.memory_space<vmem>>, vector<1x128xf32>
    %20 = vector.broadcast %19 : vector<1x128xf32> to vector<8x128xf32>
    %21 = arith.addf %18, %20 : vector<8x128xf32>
    %c0_17 = arith.constant 0 : index
    %c0_18 = arith.constant 0 : index
    %22 = vector.load %arg8[%c0_17, %c0_18] : memref<8x128xf32, #tpu.memory_space<vmem>>, vector<8x128xf32>
    tpu.vector_store %arg8[%c0_17, %c0_18], %21 {strides = array<i32>} : memref<8x128xf32, #tpu.memory_space<vmem>>, vector<8x128xf32>,
    return
  }
  func.func @transform_0(%arg0: i32) -> (i32, i32) {
    %c0_i32 = arith.constant 0 : i32
    %c0_i32_0 = arith.constant 0 : i32
    return %arg0, %c0_i32 : i32, i32
  }
  func.func @transform_1(%arg0: i32) -> (i32, i32) {
    %c0_i32 = arith.constant 0 : i32
    %c0_i32_0 = arith.constant 0 : i32
    %c0_i32_1 = arith.constant 0 : i32
    return %c0_i32, %c0_i32_0 : i32, i32
  }
  func.func @transform_2(%arg0: i32) -> (i32, i32) {
    %c0_i32 = arith.constant 0 : i32
    %c0_i32_0 = arith.constant 0 : i32
    %c0_i32_1 = arith.constant 0 : i32
    return %c0_i32, %c0_i32_0 : i32, i32
  }
  func.func @transform_3(%arg0: i32) -> (i32, i32) {
    %c0_i32 = arith.constant 0 : i32
    %c0_i32_0 = arith.constant 0 : i32
    %c0_i32_1 = arith.constant 0 : i32
    return %c0_i32, %c0_i32_0 : i32, i32
  }
  func.func @transform_4(%arg0: i32) -> (i32, i32) {
    %c0_i32 = arith.constant 0 : i32
    %c0_i32_0 = arith.constant 0 : i32
    %c0_i32_1 = arith.constant 0 : i32
    return %c0_i32, %c0_i32_0 : i32, i32
  }
  func.func @transform_5(%arg0: i32) -> (i32, i32) {
    %c0_i32 = arith.constant 0 : i32
    %c0_i32_0 = arith.constant 0 : i32
    %c0_i32_1 = arith.constant 0 : i32
    return %c0_i32, %c0_i32_0 : i32, i32
  }
  func.func @transform_6(%arg0: i32) -> (i32, i32) {
    %c0_i32 = arith.constant 0 : i32
    %c0_i32_0 = arith.constant 0 : i32
    %c0_i32_1 = arith.constant 0 : i32
    return %c0_i32, %c0_i32_0 : i32, i32
  }
  func.func @transform_7(%arg0: i32) -> (i32, i32) {
    %c0_i32 = arith.constant 0 : i32
    %c0_i32_0 = arith.constant 0 : i32
    return %arg0, %c0_i32 : i32, i32
  }
}

</mosaic_0001>

<bundles_post_ra>
// kernel: tpu_custom_call.1
= control target key start
LH: loop header
LB: loop body
LE: loop exit
PB: predicated region body
PF: predicated region fallthrough
CT: control target
= control target key end

     0   :  { %12 = vsyncpa [#allocation3], 0  ;;  %s4444_s0 = inlined_call_operand.hbm [shape: bf16[8,896], index: 0, kind: input, shape index: {}]   ;;  %s4445_s1 = inlined_call_operand.hbm [shape: bf16[896,512], index: 1, kind: input, shape index: {}]   ;;  %s4446_s2 = inlined_call_operand.hbm [shape: f32[1,512], index: 2, kind: input, shape index: {}]   ;;  %s4447_s3 = inlined_call_operand.hbm [shape: bf16[512,512], index: 3, kind: input, shape index: {}]   ;;  %s4448_s4 = inlined_call_operand.vmem [shape: f32[1,512], index: 4, kind: input, shape index: {}]   ;;  %s4449_s5 = inlined_call_operand.hbm [shape: bf16[512,128], index: 5, kind: input, shape index: {}]   ;;  %s4450_s6 = inlined_call_operand.vmem [shape: f32[1,128], index: 6, kind: input, shape index: {}]   ;;  %s4451_s7 = inlined_call_operand.hbm [shape: f32[8,128], index: 7, kind: output, shape index: {}]  }
   0x1   :  { %13 = vsyncpa [#allocation6], 0 }
   0x2   :  { %14 = vsyncpa [#allocation9], 0 }
   0x3   :  { %15 = vsyncpa [#allocation4], 0  ;;  %s4289_s24 = smov [#allocation5]  }
   0x4   :  { %s31_s25 = sshll.u32 %s4289_s24, 4  ;;  %s32_s25 = int_to_ptr.vmem [resolvable:$true] %s31_s25 }
   0x5   :  { %s4169_s26 = scalar_lea.vmem %s32_s25, 28672  ;;  %p4174_p1 = scmp.lt.s32.totalorder %s32_s25, %s32_s25 }
   0x6   :  { %p4170_p0 = scmp.ne.s32.totalorder %s32_s25, %s4169_s26  ;;  %p4175_p2 = scmp.lt.s32.totalorder %s4169_s26, %s4169_s26 }
   0x8   :  { %p4176_p3 = por %p4175_p2, %p4174_p1 }
   0xa   :  { %p4177_p4 = pnand %p4176_p3, %p4170_p0 }
   0xc   :  { %4180 = shalt.err (!%p4177_p4)
}
   0xd   :  { %s4290_s27 = smov 256   ;;  %s4291_s28 = smov 16  }
   0xe   :  { %37 = dma.hbm_to_vmem [thread:$0]  %s4445_s1, 28672, %s32_s25, [#allocation6], %s4290_s27, %s4290_s27, %s4291_s28  }
   0xf   :  { %s4292_s8 = smov [#allocation8]   ;;  %s4293_s10 = smov [#allocation2]  }
  0x10   :  { %s53_s9 = sshll.u32 %s4292_s8, 4  ;;  %s22_s11 = sshll.u32 %s4293_s10, 4  ;;  %s54_s9 = int_to_ptr.vmem [resolvable:$true] %s53_s9  ;;  %s23_s11 = int_to_ptr.vmem [resolvable:$true] %s22_s11 }
  0x11   :  { %s4189_s12 = scalar_lea.vmem %s54_s9, 16384  ;;  %p4194_p6 = scmp.lt.s32.totalorder %s54_s9, %s54_s9 }
  0x12   :  { %p4190_p5 = scmp.ne.s32.totalorder %s54_s9, %s4189_s12  ;;  %p4195_p7 = scmp.lt.s32.totalorder %s4189_s12, %s4189_s12 }
  0x14   :  { %p4196_p8 = por %p4195_p7, %p4194_p6 }
  0x16   :  { %p4197_p9 = pnand %p4196_p8, %p4190_p5 }
  0x18   :  { %4200 = shalt.err (!%p4197_p9)
}
  0x19   :  { %59 = dma.hbm_to_vmem [thread:$0]  %s4447_s3, 16384, %s54_s9, [#allocation9], %s4290_s27, %s4290_s27, %s4291_s28  }
  0x1a   :  { %s4209_s15 = scalar_lea.vmem %s23_s11, 448  ;;  %p4214_p11 = scmp.lt.s32.totalorder %s23_s11, %s23_s11 }
  0x1b   :  { %p4210_p10 = scmp.ne.s32.totalorder %s23_s11, %s4209_s15  ;;  %p4215_p12 = scmp.lt.s32.totalorder %s4209_s15, %s4209_s15 }
  0x1d   :  { %p4216_p13 = por %p4215_p12, %p4214_p11 }
  0x1f   :  { %p4217_p0 = pnand %p4216_p13, %p4210_p10 }
  0x21   :  { %4220 = shalt.err (!%p4217_p0)
}
  0x22   :  { %25 = dma.hbm_to_vmem [thread:$0]  %s4444_s0, 448, %s23_s11, [#allocation3]  }
  0x23   :  { %s4294_s17 = smov [#allocation7]   ;;  %s4295_s19 = smov [#allocation10]  }
  0x24   :  { %s44_s18 = sshll.u32 %s4294_s17, 4  ;;  %s67_s20 = sshll.u32 %s4295_s19, 4  ;;  %s45_s18 = int_to_ptr.vmem [resolvable:$true] %s44_s18  ;;  %s68_s20 = int_to_ptr.vmem [resolvable:$true] %s67_s20 }
  0x25   :  { %s4229_s21 = scalar_lea.vmem %s45_s18, 64  ;;  %p4234_p2 = scmp.lt.s32.totalorder %s45_s18, %s45_s18 }
  0x26   :  { %p4230_p1 = scmp.ne.s32.totalorder %s45_s18, %s4229_s21  ;;  %p4235_p3 = scmp.lt.s32.totalorder %s4229_s21, %s4229_s21 }
  0x28   :  { %p4236_p4 = por %p4235_p3, %p4234_p2 }
  0x2a   :  { %p4237_p5 = pnand %p4236_p4, %p4230_p1 }
  0x2c   :  { %4240 = shalt.err (!%p4237_p5)
}
  0x2d   :  { %47 = dma.hbm_to_vmem [thread:$0]  %s4446_s2, 64, %s45_s18, [#allocation6]  }
  0x2e   :  { %s4249_s23 = scalar_lea.vmem %s68_s20, 4096  ;;  %p4254_p7 = scmp.lt.s32.totalorder %s68_s20, %s68_s20 }
  0x2f   :  { %p4250_p6 = scmp.ne.s32.totalorder %s68_s20, %s4249_s23  ;;  %p4255_p8 = scmp.lt.s32.totalorder %s4249_s23, %s4249_s23 }
  0x31   :  { %p4256_p9 = por %p4255_p8, %p4254_p7 }
  0x33   :  { %p4257_p10 = pnand %p4256_p9, %p4250_p6 }
  0x35   :  { %4260 = shalt.err (!%p4257_p10)
}
  0x36   :  { %s4296_s0 = smov 64   ;;  %s4297_s24 = smov 4  }
  0x37   :  { %73 = dma.hbm_to_vmem [thread:$0]  %s4449_s5, 4096, %s68_s20, [#allocation9], %s4296_s0, %s4296_s0, %s4297_s24  }
  0x38   :  { %4281 = dma.done.wait [#allocation3], 448  }
  0x39   :  { %4282 = vsyncadd [#allocation3], 4294966848 }
  0x3a   :  { %4283 = dma.done.wait [#allocation6], 28736  }
  0x3b   :  { %4284 = vsyncadd [#allocation6], 4294938560 }
  0x3c   :  { %4285 = dma.done.wait [#allocation9], 20480  }
  0x3d   :  { %4286 = vsyncadd [#allocation9], 4294946816  ;;  %v3593_v0 = vld [vmem:[#allocation5 + $0xe4] ss:$16 sps:$4 sm:$0xff]   ;;  %v3597_v2 = vld [vmem:[#allocation5 + $0xe0] ss:$16 sps:$4 sm:$0xff]  }
  0x3e   :  { %v3595_v1 = vld [vmem:[#allocation5 + $0x2e4] ss:$16 sps:$4 sm:$0xff]   ;;  %1487 = vmatprep.subr.bf16.mxu0 %v3593_v0  ;;  %v3598_v3 = vld [vmem:[#allocation5 + $0x2e0] ss:$16 sps:$4 sm:$0xff]   ;;  %s4299_s28 = smov [#allocation11]  }
  0x3f   :  { %1528 = vmatprep.subr.bf16.mxu1 %v3595_v1  ;;  %v3599_v4 = vld [vmem:[#allocation5 + $0xc4] ss:$16 sps:$4 sm:$0xff]   ;;  %1488 = vmatpush1.bf16.msra.mxu0 %v3597_v2  ;;  %v3603_v6 = vld [vmem:[#allocation5 + $0xc0] ss:$16 sps:$4 sm:$0xff]   ;;  %s3135_s29 = sshll.u32 %s4299_s28, 4  ;;  %s3136_s29 = int_to_ptr.vmem [resolvable:$true] %s3135_s29 }
  0x40   :  { %1529 = vmatpush1.bf16.msra.mxu1 %v3598_v3  ;;  %v3601_v5 = vld [vmem:[#allocation5 + $0x2c4] ss:$16 sps:$4 sm:$0xff]   ;;  %1489 = vmatprep.subr.bf16.mxu0 %v3599_v4  ;;  %v3604_v7 = vld [vmem:[#allocation5 + $0x2c0] ss:$16 sps:$4 sm:$0xff]   ;;  %s4261_s30 = scalar_lea.vmem %s3136_s29, 128  ;;  %p4266_p12 = scmp.lt.s32.totalorder %s3136_s29, %s3136_s29 }
  0x41   :  { %1530 = vmatprep.subr.bf16.mxu1 %v3601_v5  ;;  %v3605_v8 = vld [vmem:[#allocation5 + $0xa4] ss:$16 sps:$4 sm:$0xff]   ;;  %v3609_v10 = vld [vmem:[#allocation5 + $0xa0] ss:$16 sps:$4 sm:$0xff]   ;;  %p4262_p11 = scmp.ne.s32.totalorder %s3136_s29, %s4261_s30  ;;  %p4267_p13 = scmp.lt.s32.totalorder %s4261_s30, %s4261_s30 }
  0x42   :  { %v3607_v9 = vld [vmem:[#allocation5 + $0x2a4] ss:$16 sps:$4 sm:$0xff]   ;;  %v3610_v11 = vld [vmem:[#allocation5 + $0x2a0] ss:$16 sps:$4 sm:$0xff]  }
  0x43   :  { %1490 = vmatpush1.bf16.msra.mxu0 %v3603_v6  ;;  %v3611_v12 = vld [vmem:[#allocation5 + $0x84] ss:$16 sps:$4 sm:$0xff]   ;;  %v3615_v14 = vld [vmem:[#allocation5 + $0x80] ss:$16 sps:$4 sm:$0xff]   ;;  %p4268_p0 = por %p4267_p13, %p4266_p12 }
  0x44   :  { %1531 = vmatpush1.bf16.msra.mxu1 %v3604_v7  ;;  %1491 = vmatprep.subr.bf16.mxu0 %v3605_v8  ;;  %v3613_v13 = vld [vmem:[#allocation5 + $0x284] ss:$16 sps:$4 sm:$0xff]   ;;  %v3616_v15 = vld [vmem:[#allocation5 + $0x280] ss:$16 sps:$4 sm:$0xff]  }
  0x45   :  { %1532 = vmatprep.subr.bf16.mxu1 %v3607_v9  ;;  %v3617_v16 = vld [vmem:[#allocation5 + $0x64] ss:$16 sps:$4 sm:$0xff]   ;;  %v3621_v18 = vld [vmem:[#allocation5 + $0x60] ss:$16 sps:$4 sm:$0xff]   ;;  %p4269_p1 = pnand %p4268_p0, %p4262_p11 }
  0x46   :  { %v3619_v17 = vld [vmem:[#allocation5 + $0x264] ss:$16 sps:$4 sm:$0xff]   ;;  %v3622_v19 = vld [vmem:[#allocation5 + $0x260] ss:$16 sps:$4 sm:$0xff]  }
  0x47   :  { %1492 = vmatpush1.bf16.msra.mxu0 %v3609_v10  ;;  %v3623_v20 = vld [vmem:[#allocation5 + $0x44] ss:$16 sps:$4 sm:$0xff]   ;;  %v3627_v22 = vld [vmem:[#allocation5 + $0x40] ss:$16 sps:$4 sm:$0xff]  }
  0x48   :  { %1533 = vmatpush1.bf16.msra.mxu1 %v3610_v11  ;;  %1493 = vmatprep.subr.bf16.mxu0 %v3611_v12  ;;  %v3625_v21 = vld [vmem:[#allocation5 + $0x244] ss:$16 sps:$4 sm:$0xff]   ;;  %v3628_v23 = vld [vmem:[#allocation5 + $0x240] ss:$16 sps:$4 sm:$0xff]  }
  0x49   :  { %1534 = vmatprep.subr.bf16.mxu1 %v3613_v13  ;;  %v3629_v24 = vld [vmem:[#allocation5 + $0x24] ss:$16 sps:$4 sm:$0xff]   ;;  %v3633_v26 = vld [vmem:[#allocation5 + $0x20] ss:$16 sps:$4 sm:$0xff]  }
  0x4a   :  { %v3631_v25 = vld [vmem:[#allocation5 + $0x224] ss:$16 sps:$4 sm:$0xff]   ;;  %v3634_v27 = vld [vmem:[#allocation5 + $0x220] ss:$16 sps:$4 sm:$0xff]  }
  0x4b   :  { %1494 = vmatpush1.bf16.msra.mxu0 %v3615_v14  ;;  %v3635_v28 = vld [vmem:[#allocation5 + $0x4] ss:$16 sps:$4 sm:$0xff]   ;;  %v3639_v30 = vld [vmem:[#allocation5] ss:$16 sps:$4 sm:$0xff]  }
  0x4c   :  { %1535 = vmatpush1.bf16.msra.mxu1 %v3616_v15  ;;  %1495 = vmatprep.subr.bf16.mxu0 %v3617_v16  ;;  %v3637_v29 = vld [vmem:[#allocation5 + $0x204] ss:$16 sps:$4 sm:$0xff]   ;;  %v3640_v31 = vld [vmem:[#allocation5 + $0x200] ss:$16 sps:$4 sm:$0xff]   ;;  %v4298_v16 = vmov 0  }
  0x4d   :  { %1536 = vmatprep.subr.bf16.mxu1 %v3619_v17  ;;  %v3641_v32 = vld [vmem:[#allocation5 + $0x1e4] ss:$16 sps:$4 sm:$0xff]   ;;  %v3645_v34 = vld [vmem:[#allocation5 + $0x1e0] ss:$16 sps:$4 sm:$0xff]  }
  0x4e   :  { %v3643_v33 = vld [vmem:[#allocation5 + $0x3e4] ss:$16 sps:$4 sm:$0xff]   ;;  %v3646_v35 = vld [vmem:[#allocation5 + $0x3e0] ss:$16 sps:$4 sm:$0xff]  }
  0x4f   :  { %1496 = vmatpush1.bf16.msra.mxu0 %v3621_v18  ;;  %v3647_v36 = vld [vmem:[#allocation5 + $0x1c4] ss:$16 sps:$4 sm:$0xff]   ;;  %v3651_v38 = vld [vmem:[#allocation5 + $0x1c0] ss:$16 sps:$4 sm:$0xff]  }
  0x50   :  { %1537 = vmatpush1.bf16.msra.mxu1 %v3622_v19  ;;  %1497 = vmatprep.subr.bf16.mxu0 %v3623_v20  ;;  %v3649_v37 = vld [vmem:[#allocation5 + $0x3c4] ss:$16 sps:$4 sm:$0xff]   ;;  %v3652_v39 = vld [vmem:[#allocation5 + $0x3c0] ss:$16 sps:$4 sm:$0xff]  }
  0x51   :  { %1538 = vmatprep.subr.bf16.mxu1 %v3625_v21  ;;  %v3653_v40 = vld [vmem:[#allocation5 + $0x1a4] ss:$16 sps:$4 sm:$0xff]   ;;  %v3657_v42 = vld [vmem:[#allocation5 + $0x1a0] ss:$16 sps:$4 sm:$0xff]  }
  0x52   :  { %v3655_v41 = vld [vmem:[#allocation5 + $0x3a4] ss:$16 sps:$4 sm:$0xff]   ;;  %v3658_v43 = vld [vmem:[#allocation5 + $0x3a0] ss:$16 sps:$4 sm:$0xff]  }
  0x53   :  { %1498 = vmatpush1.bf16.msra.mxu0 %v3627_v22  ;;  %v3659_v44 = vld [vmem:[#allocation5 + $0x184] ss:$16 sps:$4 sm:$0xff]   ;;  %v93_v48 = vld [vmem:[#allocation2 + $0x8] sm:$0xff] }
  0x54   :  { %1539 = vmatpush1.bf16.msra.mxu1 %v3628_v23  ;;  %1499 = vmatprep.subr.bf16.mxu0 %v3629_v24  ;;  %v3661_v45 = vld [vmem:[#allocation5 + $0x384] ss:$16 sps:$4 sm:$0xff]   ;;  %v3663_v49 = vld [vmem:[#allocation5 + $0x180] ss:$16 sps:$4 sm:$0xff]   ;;  %v4357_v51 = vcombine.high %v93_v48, %v93_v48  ;;  %v4363_v7 = vcombine.low %v93_v48, %v93_v48  ;;  %v3753_v48 = vld [vmem:[#allocation5 + $0xcc] ss:$16 sps:$4 sm:$0xff]  }
  0x55   :  { %1540 = vmatprep.subr.bf16.mxu1 %v3631_v25  ;;  %v92_v46 = vld [vmem:[#allocation2] sm:$0xff]  ;;  %v3664_v50 = vld [vmem:[#allocation5 + $0x380] ss:$16 sps:$4 sm:$0xff]  }
  0x56   :  { %v4355_v47 = vcombine.high %v92_v46, %v92_v46  ;;  %v3665_v52 = vld [vmem:[#allocation5 + $0x164] ss:$16 sps:$4 sm:$0xff]   ;;  %1560 = vmatprep.mubr.bf16.mxu1 %v4357_v51  ;;  %v3669_v54 = vld [vmem:[#allocation5 + $0x160] ss:$16 sps:$4 sm:$0xff]   ;;  %v4361_v6 = vcombine.low %v92_v46, %v92_v46 }
  0x57   :  { %1500 = vmatpush1.bf16.msra.mxu0 %v3633_v26  ;;  %v3667_v53 = vld [vmem:[#allocation5 + $0x364] ss:$16 sps:$4 sm:$0xff]   ;;  %v3670_v55 = vld [vmem:[#allocation5 + $0x360] ss:$16 sps:$4 sm:$0xff]  }
  0x58   :  { %1541 = vmatpush1.bf16.msra.mxu1 %v3634_v27  ;;  %1501 = vmatprep.subr.bf16.mxu0 %v3635_v28  ;;  %v3671_v56 = vld [vmem:[#allocation5 + $0x144] ss:$16 sps:$4 sm:$0xff]   ;;  %v3675_v58 = vld [vmem:[#allocation5 + $0x140] ss:$16 sps:$4 sm:$0xff]  }
  0x59   :  { %1542 = vmatprep.subr.bf16.mxu1 %v3637_v29  ;;  %1519 = vmatprep.mubr.bf16.mxu0 %v4355_v47  ;;  %v3673_v57 = vld [vmem:[#allocation5 + $0x344] ss:$16 sps:$4 sm:$0xff]   ;;  %v3676_v59 = vld [vmem:[#allocation5 + $0x340] ss:$16 sps:$4 sm:$0xff]  }
  0x5a   :  { %v3677_v60 = vld [vmem:[#allocation5 + $0x124] ss:$16 sps:$4 sm:$0xff]   ;;  %v3681_v62 = vld [vmem:[#allocation5 + $0x120] ss:$16 sps:$4 sm:$0xff]  }
  0x5b   :  { %1502 = vmatpush1.bf16.msra.mxu0 %v3639_v30  ;;  %v3679_v61 = vld [vmem:[#allocation5 + $0x324] ss:$16 sps:$4 sm:$0xff]   ;;  %v3682_v63 = vld [vmem:[#allocation5 + $0x320] ss:$16 sps:$4 sm:$0xff]  }
  0x5c   :  { %1543 = vmatpush1.bf16.msra.mxu1 %v3640_v31  ;;  %1503 = vmatprep.subr.bf16.mxu0 %v3641_v32  ;;  %v3683_v0 = vld [vmem:[#allocation5 + $0x104] ss:$16 sps:$4 sm:$0xff]   ;;  %v3687_v2 = vld [vmem:[#allocation5 + $0x100] ss:$16 sps:$4 sm:$0xff]  }
  0x5d   :  { %1544 = vmatprep.subr.bf16.mxu1 %v3643_v33  ;;  %v3685_v1 = vld [vmem:[#allocation5 + $0x304] ss:$16 sps:$4 sm:$0xff]   ;;  %v3688_v3 = vld [vmem:[#allocation5 + $0x300] ss:$16 sps:$4 sm:$0xff]  }
  0x5e   :  { %v3695_v4 = vld [vmem:[#allocation5 + $0x4e4] ss:$16 sps:$4 sm:$0xff]   ;;  %v3693_v8 = vld [vmem:[#allocation5 + $0x4e0] ss:$16 sps:$4 sm:$0xff]  }
  0x5f   :  { %1504 = vmatpush2.bf16.msra.mxu0 %v3645_v34  ;;  %v3698_v5 = vld [vmem:[#allocation5 + $0x6e4] ss:$16 sps:$4 sm:$0xff]   ;;  %v3696_v9 = vld [vmem:[#allocation5 + $0x6e0] ss:$16 sps:$4 sm:$0xff]  }
  0x60   :  { %1545 = vmatpush2.bf16.msra.mxu1 %v3646_v35  ;;  %1505 = vmatprep.subr.bf16.mxu0 %v3647_v36  ;;  %v3701_v10 = vld [vmem:[#allocation5 + $0x4c4] ss:$16 sps:$4 sm:$0xff]   ;;  %v3699_v12 = vld [vmem:[#allocation5 + $0x4c0] ss:$16 sps:$4 sm:$0xff]  }
  0x61   :  { %1546 = vmatprep.subr.bf16.mxu1 %v3649_v37  ;;  %v3704_v11 = vld [vmem:[#allocation5 + $0x6c4] ss:$16 sps:$4 sm:$0xff]   ;;  %v3702_v13 = vld [vmem:[#allocation5 + $0x6c0] ss:$16 sps:$4 sm:$0xff]  }
  0x62   :  { %v3707_v14 = vld [vmem:[#allocation5 + $0x4a4] ss:$16 sps:$4 sm:$0xff]   ;;  %v3705_v17 = vld [vmem:[#allocation5 + $0x4a0] ss:$16 sps:$4 sm:$0xff]  }
  0x63   :  { %1506 = vmatpush2.bf16.msra.mxu0 %v3651_v38  ;;  %v3710_v15 = vld [vmem:[#allocation5 + $0x6a4] ss:$16 sps:$4 sm:$0xff]   ;;  %v3708_v18 = vld [vmem:[#allocation5 + $0x6a0] ss:$16 sps:$4 sm:$0xff]  }
  0x64   :  { %1547 = vmatpush2.bf16.msra.mxu1 %v3652_v39  ;;  %1507 = vmatprep.subr.bf16.mxu0 %v3653_v40  ;;  %v3713_v19 = vld [vmem:[#allocation5 + $0x484] ss:$16 sps:$4 sm:$0xff]   ;;  %v3711_v21 = vld [vmem:[#allocation5 + $0x480] ss:$16 sps:$4 sm:$0xff]  }
  0x65   :  { %1548 = vmatprep.subr.bf16.mxu1 %v3655_v41  ;;  %v3716_v20 = vld [vmem:[#allocation5 + $0x684] ss:$16 sps:$4 sm:$0xff]   ;;  %v3714_v22 = vld [vmem:[#allocation5 + $0x680] ss:$16 sps:$4 sm:$0xff]  }
  0x66   :  { %v3719_v23 = vld [vmem:[#allocation5 + $0x464] ss:$16 sps:$4 sm:$0xff]   ;;  %v3717_v25 = vld [vmem:[#allocation5 + $0x460] ss:$16 sps:$4 sm:$0xff]  }
  0x67   :  { %1508 = vmatpush2.bf16.msra.mxu0 %v3657_v42  ;;  %v3722_v24 = vld [vmem:[#allocation5 + $0x664] ss:$16 sps:$4 sm:$0xff]   ;;  %v3720_v26 = vld [vmem:[#allocation5 + $0x660] ss:$16 sps:$4 sm:$0xff]   ;;  %v3747_v42 = vld [vmem:[#allocation5 + $0xec] ss:$16 sps:$4 sm:$0xff]  }
  0x68   :  { %1549 = vmatpush2.bf16.msra.mxu1 %v3658_v43  ;;  %1509 = vmatprep.subr.bf16.mxu0 %v3659_v44  ;;  %v3725_v27 = vld [vmem:[#allocation5 + $0x444] ss:$16 sps:$4 sm:$0xff]   ;;  %v3723_v29 = vld [vmem:[#allocation5 + $0x440] ss:$16 sps:$4 sm:$0xff]   ;;  %v3744_v44 = vld [vmem:[#allocation2 + $0x18] ss:$0 sps:$4 sm:$0xff]  }
  0x69   :  { %1550 = vmatprep.subr.bf16.mxu1 %v3661_v45  ;;  %v3728_v28 = vld [vmem:[#allocation5 + $0x644] ss:$16 sps:$4 sm:$0xff]   ;;  %v3726_v30 = vld [vmem:[#allocation5 + $0x640] ss:$16 sps:$4 sm:$0xff]   ;;  %v3745_v45 = vld [vmem:[#allocation5 + $0xe8] ss:$16 sps:$4 sm:$0xff]  }
  0x6a   :  { %v3731_v31 = vld [vmem:[#allocation5 + $0x424] ss:$16 sps:$4 sm:$0xff]   ;;  %v3729_v34 = vld [vmem:[#allocation5 + $0x420] ss:$16 sps:$4 sm:$0xff]  }
  0x6b   :  { %1510 = vmatpush2.bf16.msra.mxu0 %v3663_v49  ;;  %v3734_v32 = vld [vmem:[#allocation5 + $0x624] ss:$16 sps:$4 sm:$0xff]   ;;  %v3732_v36 = vld [vmem:[#allocation5 + $0x620] ss:$16 sps:$4 sm:$0xff]  }
  0x6c   :  { %1551 = vmatpush2.bf16.msra.mxu1 %v3664_v50  ;;  %1511 = vmatprep.subr.bf16.mxu0 %v3665_v52  ;;  %v4368_v33 = vld [vmem:[#allocation2 + $0x10] sm:$0xff]  ;;  %v3735_v39 = vld [vmem:[#allocation5 + $0x400] ss:$16 sps:$4 sm:$0xff]  }
  0x6d   :  { %1552 = vmatprep.subr.bf16.mxu1 %v3667_v53  ;;  %v4372_v35 = vcombine.high %v4368_v33, %v4368_v33  ;;  %v3737_v37 = vld [vmem:[#allocation5 + $0x404] ss:$16 sps:$4 sm:$0xff]   ;;  %v3738_v40 = vld [vmem:[#allocation5 + $0x600] ss:$16 sps:$4 sm:$0xff]   ;;  %v3751_v50 = vld [vmem:[#allocation5 + $0xc8] ss:$16 sps:$4 sm:$0xff]  }
  0x6e   :  { %v3740_v38 = vld [vmem:[#allocation5 + $0x604] ss:$16 sps:$4 sm:$0xff]   ;;  %v3741_v43 = vld [vmem:[#allocation5 + $0x5e0] ss:$16 sps:$4 sm:$0xff]   ;;  %v3759_v53 = vld [vmem:[#allocation5 + $0xac] ss:$16 sps:$4 sm:$0xff]  }
  0x6f   :  { %1512 = vmatpush2.bf16.msra.mxu0 %v3669_v54  ;;  %v3743_v41 = vld [vmem:[#allocation5 + $0x5e4] ss:$16 sps:$4 sm:$0xff]   ;;  %v3748_v49 = vld [vmem:[#allocation5 + $0x5c0] ss:$16 sps:$4 sm:$0xff]  }
  0x70   :  { %1553 = vmatpush2.bf16.msra.mxu1 %v3670_v55  ;;  %1513 = vmatprep.subr.bf16.mxu0 %v3671_v56  ;;  %v3750_v46 = vld [vmem:[#allocation5 + $0x5c4] ss:$16 sps:$4 sm:$0xff]   ;;  %v3754_v54 = vld [vmem:[#allocation5 + $0x5a0] ss:$16 sps:$4 sm:$0xff]   ;;  %v3757_v55 = vld [vmem:[#allocation5 + $0xa8] ss:$16 sps:$4 sm:$0xff]  }
  0x71   :  { %1554 = vmatprep.subr.bf16.mxu1 %v3673_v57  ;;  %v3756_v52 = vld [vmem:[#allocation5 + $0x5a4] ss:$16 sps:$4 sm:$0xff]   ;;  %v3765_v57 = vld [vmem:[#allocation5 + $0x8c] ss:$16 sps:$4 sm:$0xff]  }
  0x72   :  { %v3762_v56 = vld [vmem:[#allocation5 + $0x584] ss:$16 sps:$4 sm:$0xff]  }
  0x73   :  { %1514 = vmatpush2.bf16.msra.mxu0 %v3675_v58  ;;  %v3760_v58 = vld [vmem:[#allocation5 + $0x580] ss:$16 sps:$4 sm:$0xff]  }
  0x74   :  { %1555 = vmatpush2.bf16.msra.mxu1 %v3676_v59  ;;  %1515 = vmatprep.subr.bf16.mxu0 %v3677_v60  ;;  %v3763_v59 = vld [vmem:[#allocation5 + $0x88] ss:$16 sps:$4 sm:$0xff]   ;;  %v3768_v60 = vld [vmem:[#allocation5 + $0x564] ss:$16 sps:$4 sm:$0xff]  }
  0x75   :  { %1556 = vmatprep.subr.bf16.mxu1 %v3679_v61  ;;  %v3771_v61 = vld [vmem:[#allocation5 + $0x6c] ss:$16 sps:$4 sm:$0xff]  }
  0x77   :  { %1516 = vmatpush2.bf16.msra.mxu0 %v3681_v62  ;;  %v3766_v62 = vld [vmem:[#allocation5 + $0x560] ss:$16 sps:$4 sm:$0xff]  }
  0x78   :  { %1557 = vmatpush2.bf16.msra.mxu1 %v3682_v63  ;;  %1517 = vmatprep.subr.bf16.mxu0 %v3683_v0  ;;  %v3774_v63 = vld [vmem:[#allocation5 + $0x544] ss:$16 sps:$4 sm:$0xff]   ;;  %v3777_v0 = vld [vmem:[#allocation5 + $0x4c] ss:$16 sps:$4 sm:$0xff]  }
  0x79   :  { %1558 = vmatprep.subr.bf16.mxu1 %v3685_v1  ;;  %v3772_v1 = vld [vmem:[#allocation5 + $0x540] ss:$16 sps:$4 sm:$0xff]  }
  0x7b   :  { %1518 = vmatpush2.bf16.msra.mxu0 %v3687_v2  ;;  %v3775_v2 = vld [vmem:[#allocation5 + $0x48] ss:$16 sps:$4 sm:$0xff]  }
  0x7c   :  { %1559 = vmatpush2.bf16.msra.mxu1 %v3688_v3  ;;  %1569 = vmatprep.subr.bf16.mxu0 %v3695_v4  ;;  %v3780_v3 = vld [vmem:[#allocation5 + $0x524] ss:$16 sps:$4 sm:$0xff]   ;;  %v3783_v4 = vld [vmem:[#allocation5 + $0x2c] ss:$16 sps:$4 sm:$0xff]  }
  0x7d   :  { %1610 = vmatprep.subr.bf16.mxu1 %v3698_v5  ;;  %v3778_v5 = vld [vmem:[#allocation5 + $0x520] ss:$16 sps:$4 sm:$0xff]  }
  0x7e   :  { %1520 = vmatmul.mubr.bf16.vlgmr.msra.gmra.mxu0 %v4361_v6 }
  0x7f   :  { %1561 = vmatmul.mubr.bf16.vlgmr.msra.gmra.mxu1 %v4363_v7  ;;  %1570 = vmatpush1.bf16.msra.mxu0 %v3693_v8  ;;  %v3781_v8 = vld [vmem:[#allocation5 + $0x28] ss:$16 sps:$4 sm:$0xff]  }
  0x80   :  { %1611 = vmatpush1.bf16.msra.mxu1 %v3696_v9  ;;  %1571 = vmatprep.subr.bf16.mxu0 %v3701_v10  ;;  %v3786_v9 = vld [vmem:[#allocation5 + $0x504] ss:$16 sps:$4 sm:$0xff]   ;;  %v3789_v10 = vld [vmem:[#allocation5 + $0xc] ss:$16 sps:$4 sm:$0xff]  }
  0x81   :  { %1612 = vmatprep.subr.bf16.mxu1 %v3704_v11  ;;  %1642 = vmatprep.mubr.bf16.mxu1 %v4298_v16  ;;  %v3784_v11 = vld [vmem:[#allocation5 + $0x500] ss:$16 sps:$4 sm:$0xff]  }
  0x82   :  { %1601 = vmatprep.mubr.bf16.mxu0 %v4372_v35 }
  0x83   :  { %1572 = vmatpush1.bf16.msra.mxu0 %v3699_v12  ;;  %v3787_v12 = vld [vmem:[#allocation5 + $0x8] ss:$16 sps:$4 sm:$0xff]  }
  0x84   :  { %1613 = vmatpush1.bf16.msra.mxu1 %v3702_v13  ;;  %1573 = vmatprep.subr.bf16.mxu0 %v3707_v14  ;;  %v3794_v13 = vld [vmem:[#allocation5 + $0x1ec] ss:$16 sps:$4 sm:$0xff]  }
  0x85   :  { %1614 = vmatprep.subr.bf16.mxu1 %v3710_v15  ;;  %v3797_v14 = vld [vmem:[#allocation5 + $0x2ec] ss:$16 sps:$4 sm:$0xff]   ;;  %v4378_v15 = vcombine.low %v4368_v33, %v4368_v33  ;;  %v3816_v33 = vld [vmem:[#allocation5 + $0x168] ss:$16 sps:$4 sm:$0xff]  }
  0x87   :  { %1574 = vmatpush1.bf16.msra.mxu0 %v3705_v17  ;;  %v3792_v17 = vld [vmem:[#allocation5 + $0x1e8] ss:$16 sps:$4 sm:$0xff]  }
  0x88   :  { %1615 = vmatpush1.bf16.msra.mxu1 %v3708_v18  ;;  %1575 = vmatprep.subr.bf16.mxu0 %v3713_v19  ;;  %v3795_v18 = vld [vmem:[#allocation5 + $0x2e8] ss:$16 sps:$4 sm:$0xff]   ;;  %v3800_v19 = vld [vmem:[#allocation5 + $0x1cc] ss:$16 sps:$4 sm:$0xff]  }
  0x89   :  { %1616 = vmatprep.subr.bf16.mxu1 %v3716_v20  ;;  %v3803_v20 = vld [vmem:[#allocation5 + $0x2cc] ss:$16 sps:$4 sm:$0xff]  }
  0x8b   :  { %1576 = vmatpush1.bf16.msra.mxu0 %v3711_v21  ;;  %v3798_v21 = vld [vmem:[#allocation5 + $0x1c8] ss:$16 sps:$4 sm:$0xff]  }
  0x8c   :  { %1617 = vmatpush1.bf16.msra.mxu1 %v3714_v22  ;;  %1577 = vmatprep.subr.bf16.mxu0 %v3719_v23  ;;  %v3801_v22 = vld [vmem:[#allocation5 + $0x2c8] ss:$16 sps:$4 sm:$0xff]   ;;  %v3806_v23 = vld [vmem:[#allocation5 + $0x1ac] ss:$16 sps:$4 sm:$0xff]  }
  0x8d   :  { %1618 = vmatprep.subr.bf16.mxu1 %v3722_v24  ;;  %v3809_v24 = vld [vmem:[#allocation5 + $0x2ac] ss:$16 sps:$4 sm:$0xff]  }
  0x8f   :  { %1578 = vmatpush1.bf16.msra.mxu0 %v3717_v25  ;;  %v3804_v25 = vld [vmem:[#allocation5 + $0x1a8] ss:$16 sps:$4 sm:$0xff]  }
  0x90   :  { %1619 = vmatpush1.bf16.msra.mxu1 %v3720_v26  ;;  %1579 = vmatprep.subr.bf16.mxu0 %v3725_v27  ;;  %v3807_v26 = vld [vmem:[#allocation5 + $0x2a8] ss:$16 sps:$4 sm:$0xff]   ;;  %v3812_v27 = vld [vmem:[#allocation5 + $0x18c] ss:$16 sps:$4 sm:$0xff]  }
  0x91   :  { %1620 = vmatprep.subr.bf16.mxu1 %v3728_v28  ;;  %v3815_v28 = vld [vmem:[#allocation5 + $0x28c] ss:$16 sps:$4 sm:$0xff]  }
  0x93   :  { %1580 = vmatpush1.bf16.msra.mxu0 %v3723_v29  ;;  %v3810_v29 = vld [vmem:[#allocation5 + $0x188] ss:$16 sps:$4 sm:$0xff]  }
  0x94   :  { %1621 = vmatpush1.bf16.msra.mxu1 %v3726_v30  ;;  %1581 = vmatprep.subr.bf16.mxu0 %v3731_v31  ;;  %v3813_v30 = vld [vmem:[#allocation5 + $0x288] ss:$16 sps:$4 sm:$0xff]   ;;  %v3818_v31 = vld [vmem:[#allocation5 + $0x16c] ss:$16 sps:$4 sm:$0xff]  }
  0x95   :  { %1622 = vmatprep.subr.bf16.mxu1 %v3734_v32  ;;  %v3821_v32 = vld [vmem:[#allocation5 + $0x26c] ss:$16 sps:$4 sm:$0xff]  }
  0x97   :  { %1582 = vmatpush1.bf16.msra.mxu0 %v3729_v34  ;;  %v3824_v34 = vld [vmem:[#allocation5 + $0x14c] ss:$16 sps:$4 sm:$0xff]  }
  0x98   :  { %1623 = vmatpush1.bf16.msra.mxu1 %v3732_v36  ;;  %1583 = vmatprep.subr.bf16.mxu0 %v3737_v37  ;;  %v3827_v36 = vld [vmem:[#allocation5 + $0x24c] ss:$16 sps:$4 sm:$0xff]   ;;  %v3822_v37 = vld [vmem:[#allocation5 + $0x148] ss:$16 sps:$4 sm:$0xff]  }
  0x99   :  { %1624 = vmatprep.subr.bf16.mxu1 %v3740_v38  ;;  %v3825_v38 = vld [vmem:[#allocation5 + $0x248] ss:$16 sps:$4 sm:$0xff]  }
  0x9b   :  { %1584 = vmatpush1.bf16.msra.mxu0 %v3735_v39  ;;  %v3830_v39 = vld [vmem:[#allocation5 + $0x12c] ss:$16 sps:$4 sm:$0xff]  }
  0x9c   :  { %1625 = vmatpush1.bf16.msra.mxu1 %v3738_v40  ;;  %1585 = vmatprep.subr.bf16.mxu0 %v3743_v41  ;;  %v3833_v40 = vld [vmem:[#allocation5 + $0x22c] ss:$16 sps:$4 sm:$0xff]   ;;  %v3828_v41 = vld [vmem:[#allocation5 + $0x128] ss:$16 sps:$4 sm:$0xff]  }
  0x9d   :  { %1651 = vmatprep.subr.bf16.mxu1 %v3747_v42  ;;  %v3831_v42 = vld [vmem:[#allocation5 + $0x228] ss:$16 sps:$4 sm:$0xff]  }
  0x9f   :  { %1643 = vmatmul.mubr.bf16.vlgmr.msra.gmra.mxu1 %v3744_v44  ;;  %1586 = vmatpush2.bf16.msra.mxu0 %v3741_v43  ;;  %v3836_v43 = vld [vmem:[#allocation5 + $0x10c] ss:$16 sps:$4 sm:$0xff]  }
  0xa0   :  { %1652 = vmatpush1.bf16.msra.mxu1 %v3745_v45  ;;  %1587 = vmatprep.subr.bf16.mxu0 %v3750_v46  ;;  %v3839_v44 = vld [vmem:[#allocation5 + $0x20c] ss:$16 sps:$4 sm:$0xff]   ;;  %v3834_v45 = vld [vmem:[#allocation5 + $0x108] ss:$16 sps:$4 sm:$0xff]  }
  0xa1   :  { %1653 = vmatprep.subr.bf16.mxu1 %v3753_v48  ;;  %1683 = vmatprep.mubr.bf16.mxu1 %v4355_v47  ;;  %v3769_v47 = vld [vmem:[#allocation5 + $0x68] ss:$16 sps:$4 sm:$0xff]   ;;  %v3842_v48 = vld [vmem:[#allocation5 + $0x3ec] ss:$16 sps:$4 sm:$0xff]  }
  0xa2   :  { %v3837_v46 = vld [vmem:[#allocation5 + $0x208] ss:$16 sps:$4 sm:$0xff]  }
  0xa3   :  { %1588 = vmatpush2.bf16.msra.mxu0 %v3748_v49  ;;  %v3845_v49 = vld [vmem:[#allocation5 + $0x4ec] ss:$16 sps:$4 sm:$0xff]  }
  0xa4   :  { %1654 = vmatpush1.bf16.msra.mxu1 %v3751_v50  ;;  %1589 = vmatprep.subr.bf16.mxu0 %v3756_v52  ;;  %v3840_v50 = vld [vmem:[#allocation5 + $0x3e8] ss:$16 sps:$4 sm:$0xff]  }
  0xa5   :  { %1655 = vmatprep.subr.bf16.mxu1 %v3759_v53  ;;  %v3843_v52 = vld [vmem:[#allocation5 + $0x4e8] ss:$16 sps:$4 sm:$0xff]   ;;  %v3848_v53 = vld [vmem:[#allocation5 + $0x3cc] ss:$16 sps:$4 sm:$0xff]  }
  0xa7   :  { %1590 = vmatpush2.bf16.msra.mxu0 %v3754_v54  ;;  %v3851_v54 = vld [vmem:[#allocation5 + $0x4cc] ss:$16 sps:$4 sm:$0xff]  }
  0xa8   :  { %1656 = vmatpush1.bf16.msra.mxu1 %v3757_v55  ;;  %1591 = vmatprep.subr.bf16.mxu0 %v3762_v56  ;;  %v3846_v55 = vld [vmem:[#allocation5 + $0x3c8] ss:$16 sps:$4 sm:$0xff]  }
  0xa9   :  { %1657 = vmatprep.subr.bf16.mxu1 %v3765_v57  ;;  %v3849_v56 = vld [vmem:[#allocation5 + $0x4c8] ss:$16 sps:$4 sm:$0xff]   ;;  %v3854_v57 = vld [vmem:[#allocation5 + $0x3ac] ss:$16 sps:$4 sm:$0xff]  }
  0xab   :  { %1592 = vmatpush2.bf16.msra.mxu0 %v3760_v58  ;;  %v3857_v58 = vld [vmem:[#allocation5 + $0x4ac] ss:$16 sps:$4 sm:$0xff]  }
  0xac   :  { %1658 = vmatpush1.bf16.msra.mxu1 %v3763_v59  ;;  %1593 = vmatprep.subr.bf16.mxu0 %v3768_v60  ;;  %v3852_v59 = vld [vmem:[#allocation5 + $0x3a8] ss:$16 sps:$4 sm:$0xff]  }
  0xad   :  { %1659 = vmatprep.subr.bf16.mxu1 %v3771_v61  ;;  %v3855_v60 = vld [vmem:[#allocation5 + $0x4a8] ss:$16 sps:$4 sm:$0xff]   ;;  %v3860_v61 = vld [vmem:[#allocation5 + $0x38c] ss:$16 sps:$4 sm:$0xff]  }
  0xaf   :  { %1594 = vmatpush2.bf16.msra.mxu0 %v3766_v62  ;;  %v3863_v62 = vld [vmem:[#allocation5 + $0x48c] ss:$16 sps:$4 sm:$0xff]  }
  0xb0   :  { %1660 = vmatpush1.bf16.msra.mxu1 %v3769_v47  ;;  %1595 = vmatprep.subr.bf16.mxu0 %v3774_v63  ;;  %v3858_v47 = vld [vmem:[#allocation5 + $0x388] ss:$16 sps:$4 sm:$0xff]   ;;  %v3866_v63 = vld [vmem:[#allocation5 + $0x36c] ss:$16 sps:$4 sm:$0xff]  }
  0xb1   :  { %1661 = vmatprep.subr.bf16.mxu1 %v3777_v0  ;;  %v3869_v0 = vld [vmem:[#allocation5 + $0x46c] ss:$16 sps:$4 sm:$0xff]  }
  0xb3   :  { %1596 = vmatpush2.bf16.msra.mxu0 %v3772_v1  ;;  %v3864_v1 = vld [vmem:[#allocation5 + $0x368] ss:$16 sps:$4 sm:$0xff]  }
  0xb4   :  { %1662 = vmatpush1.bf16.msra.mxu1 %v3775_v2  ;;  %1597 = vmatprep.subr.bf16.mxu0 %v3780_v3  ;;  %v3867_v2 = vld [vmem:[#allocation5 + $0x468] ss:$16 sps:$4 sm:$0xff]   ;;  %v3872_v3 = vld [vmem:[#allocation5 + $0x34c] ss:$16 sps:$4 sm:$0xff]  }
  0xb5   :  { %1663 = vmatprep.subr.bf16.mxu1 %v3783_v4  ;;  %v3875_v4 = vld [vmem:[#allocation5 + $0x44c] ss:$16 sps:$4 sm:$0xff]  }
  0xb7   :  { %1598 = vmatpush2.bf16.msra.mxu0 %v3778_v5  ;;  %v3873_v5 = vld [vmem:[#allocation5 + $0x448] ss:$16 sps:$4 sm:$0xff]  }
  0xb8   :  { %1664 = vmatpush1.bf16.msra.mxu1 %v3781_v8  ;;  %1599 = vmatprep.subr.bf16.mxu0 %v3786_v9  ;;  %v3878_v8 = vld [vmem:[#allocation5 + $0x32c] ss:$16 sps:$4 sm:$0xff]  }
  0xb9   :  { %1665 = vmatprep.subr.bf16.mxu1 %v3789_v10  ;;  %v3881_v9 = vld [vmem:[#allocation5 + $0x42c] ss:$16 sps:$4 sm:$0xff]   ;;  %v3876_v10 = vld [vmem:[#allocation5 + $0x328] ss:$16 sps:$4 sm:$0xff]  }
  0xbb   :  { %1600 = vmatpush2.bf16.msra.mxu0 %v3784_v11  ;;  %v3879_v11 = vld [vmem:[#allocation5 + $0x428] ss:$16 sps:$4 sm:$0xff]  }
  0xbc   :  { %1666 = vmatpush1.bf16.msra.mxu1 %v3787_v12  ;;  %1692 = vmatprep.subr.bf16.mxu0 %v3797_v14  ;;  %v3884_v12 = vld [vmem:[#allocation5 + $0x30c] ss:$16 sps:$4 sm:$0xff]   ;;  %v3882_v14 = vld [vmem:[#allocation5 + $0x308] ss:$16 sps:$4 sm:$0xff]  }
  0xbd   :  { %1667 = vmatprep.subr.bf16.mxu1 %v3794_v13  ;;  %v3887_v13 = vld [vmem:[#allocation5 + $0x40c] ss:$16 sps:$4 sm:$0xff]  }
  0xbe   :  { %1602 = vmatmul.mubr.bf16.vlgmr.msra.gmra.mxu0 %v4378_v15 }
  0xbf   :  { %1693 = vmatpush1.bf16.msra.mxu0 %v3795_v18  ;;  %1724 = vmatprep.mubr.bf16.mxu0 %v4357_v51  ;;  %v3819_v51 = vld [vmem:[#allocation5 + $0x268] ss:$16 sps:$4 sm:$0xff]   ;;  %v3890_v18 = vld [vmem:[#allocation5 + $0x5ec] ss:$16 sps:$4 sm:$0xff]  }
  0xc0   :  { %1668 = vmatpush2.bf16.msra.mxu1 %v3792_v17  ;;  %1694 = vmatprep.subr.bf16.mxu0 %v3803_v20  ;;  %v3885_v17 = vld [vmem:[#allocation5 + $0x408] ss:$16 sps:$4 sm:$0xff]  }
  0xc1   :  { %1669 = vmatprep.subr.bf16.mxu1 %v3800_v19  ;;  %v3893_v19 = vld [vmem:[#allocation5 + $0x6ec] ss:$16 sps:$4 sm:$0xff]   ;;  %v3888_v20 = vld [vmem:[#allocation5 + $0x5e8] ss:$16 sps:$4 sm:$0xff]  }
  0xc3   :  { %1695 = vmatpush1.bf16.msra.mxu0 %v3801_v22  ;;  %v3896_v22 = vld [vmem:[#allocation5 + $0x5cc] ss:$16 sps:$4 sm:$0xff]  }
  0xc4   :  { %1670 = vmatpush2.bf16.msra.mxu1 %v3798_v21  ;;  %1696 = vmatprep.subr.bf16.mxu0 %v3809_v24  ;;  %v3891_v21 = vld [vmem:[#allocation5 + $0x6e8] ss:$16 sps:$4 sm:$0xff]  }
  0xc5   :  { %1671 = vmatprep.subr.bf16.mxu1 %v3806_v23  ;;  %v3899_v23 = vld [vmem:[#allocation5 + $0x6cc] ss:$16 sps:$4 sm:$0xff]   ;;  %v3894_v24 = vld [vmem:[#allocation5 + $0x5c8] ss:$16 sps:$4 sm:$0xff]  }
  0xc7   :  { %1697 = vmatpush1.bf16.msra.mxu0 %v3807_v26  ;;  %v3902_v26 = vld [vmem:[#allocation5 + $0x5ac] ss:$16 sps:$4 sm:$0xff]  }
  0xc8   :  { %1672 = vmatpush2.bf16.msra.mxu1 %v3804_v25  ;;  %1698 = vmatprep.subr.bf16.mxu0 %v3815_v28  ;;  %v3897_v25 = vld [vmem:[#allocation5 + $0x6c8] ss:$16 sps:$4 sm:$0xff]  }
  0xc9   :  { %1673 = vmatprep.subr.bf16.mxu1 %v3812_v27  ;;  %v3905_v27 = vld [vmem:[#allocation5 + $0x6ac] ss:$16 sps:$4 sm:$0xff]   ;;  %v3900_v28 = vld [vmem:[#allocation5 + $0x5a8] ss:$16 sps:$4 sm:$0xff]  }
  0xcb   :  { %1699 = vmatpush1.bf16.msra.mxu0 %v3813_v30  ;;  %v3908_v30 = vld [vmem:[#allocation5 + $0x58c] ss:$16 sps:$4 sm:$0xff]  }
  0xcc   :  { %1674 = vmatpush2.bf16.msra.mxu1 %v3810_v29  ;;  %1700 = vmatprep.subr.bf16.mxu0 %v3821_v32  ;;  %v3903_v29 = vld [vmem:[#allocation5 + $0x6a8] ss:$16 sps:$4 sm:$0xff]  }
  0xcd   :  { %1675 = vmatprep.subr.bf16.mxu1 %v3818_v31  ;;  %v3911_v31 = vld [vmem:[#allocation5 + $0x68c] ss:$16 sps:$4 sm:$0xff]   ;;  %v3906_v32 = vld [vmem:[#allocation5 + $0x588] ss:$16 sps:$4 sm:$0xff]  }
  0xcf   :  { %1701 = vmatpush1.bf16.msra.mxu0 %v3819_v51  ;;  %v3917_v51 = vld [vmem:[#allocation5 + $0x66c] ss:$16 sps:$4 sm:$0xff]  }
  0xd0   :  { %1676 = vmatpush2.bf16.msra.mxu1 %v3816_v33  ;;  %1702 = vmatprep.subr.bf16.mxu0 %v3827_v36  ;;  %v3909_v33 = vld [vmem:[#allocation5 + $0x688] ss:$16 sps:$4 sm:$0xff]  }
  0xd1   :  { %1677 = vmatprep.subr.bf16.mxu1 %v3824_v34  ;;  %v3912_v34 = vld [vmem:[#allocation5 + $0x568] ss:$16 sps:$4 sm:$0xff]  }
  0xd2   :  { %v3915_v36 = vld [vmem:[#allocation5 + $0x668] ss:$16 sps:$4 sm:$0xff]  }
  0xd3   :  { %1703 = vmatpush1.bf16.msra.mxu0 %v3825_v38  ;;  %v3918_v38 = vld [vmem:[#allocation5 + $0x548] ss:$16 sps:$4 sm:$0xff]  }
  0xd4   :  { %1678 = vmatpush2.bf16.msra.mxu1 %v3822_v37  ;;  %1704 = vmatprep.subr.bf16.mxu0 %v3833_v40  ;;  %v3920_v37 = vld [vmem:[#allocation5 + $0x54c] ss:$16 sps:$4 sm:$0xff]  }
  0xd5   :  { %1679 = vmatprep.subr.bf16.mxu1 %v3830_v39  ;;  %v3921_v39 = vld [vmem:[#allocation5 + $0x648] ss:$16 sps:$4 sm:$0xff]   ;;  %v3926_v40 = vld [vmem:[#allocation5 + $0x52c] ss:$16 sps:$4 sm:$0xff]  }
  0xd7   :  { %1705 = vmatpush1.bf16.msra.mxu0 %v3831_v42  ;;  %v3924_v42 = vld [vmem:[#allocation5 + $0x528] ss:$16 sps:$4 sm:$0xff]  }
  0xd8   :  { %1680 = vmatpush2.bf16.msra.mxu1 %v3828_v41  ;;  %1706 = vmatprep.subr.bf16.mxu0 %v3839_v44  ;;  %v3929_v41 = vld [vmem:[#allocation5 + $0x62c] ss:$16 sps:$4 sm:$0xff]  }
  0xd9   :  { %1681 = vmatprep.subr.bf16.mxu1 %v3836_v43  ;;  %v3927_v43 = vld [vmem:[#allocation5 + $0x628] ss:$16 sps:$4 sm:$0xff]   ;;  %v3932_v44 = vld [vmem:[#allocation5 + $0x50c] ss:$16 sps:$4 sm:$0xff]  }
  0xdb   :  { %1707 = vmatpush1.bf16.msra.mxu0 %v3837_v46  ;;  %v3930_v46 = vld [vmem:[#allocation5 + $0x508] ss:$16 sps:$4 sm:$0xff]  }
  0xdc   :  { %1682 = vmatpush2.bf16.msra.mxu1 %v3834_v45  ;;  %1708 = vmatprep.subr.bf16.mxu0 %v3842_v48  ;;  %v3935_v45 = vld [vmem:[#allocation5 + $0x60c] ss:$16 sps:$4 sm:$0xff]   ;;  %v3933_v48 = vld [vmem:[#allocation5 + $0x608] ss:$16 sps:$4 sm:$0xff]  }
  0xdd   :  { %1733 = vmatprep.subr.bf16.mxu1 %v3845_v49  ;;  %v3938_v49 = vld [vmem:[#allocation8 + $0xe4] ss:$16 sps:$4 sm:$0xff]  }
  0xdf   :  { %1684 = vmatmul.mubr.bf16.vlgmr.msra.gmra.mxu1 %v4361_v6  ;;  %1709 = vmatpush2.bf16.msra.mxu0 %v3840_v50  ;;  %v3861_v6 = vld [vmem:[#allocation5 + $0x488] ss:$16 sps:$4 sm:$0xff]   ;;  %v3936_v50 = vld [vmem:[#allocation8 + $0xe0] ss:$16 sps:$4 sm:$0xff]  }
  0xe0   :  { %1734 = vmatpush1.bf16.msra.mxu1 %v3843_v52  ;;  %1710 = vmatprep.subr.bf16.mxu0 %v3848_v53  ;;  %v3941_v52 = vld [vmem:[#allocation8 + $0xc4] ss:$16 sps:$4 sm:$0xff]   ;;  %v4160_v53 = vld [vmem:[#allocation2 + $0x18] ss:$0 sps:$4 sm:$0xff]  }
  0xe1   :  { %1735 = vmatprep.subr.bf16.mxu1 %v3851_v54  ;;  %1765 = vmatprep.mubr.bf16.mxu1 %v4372_v35  ;;  %v3870_v35 = vld [vmem:[#allocation5 + $0x348] ss:$16 sps:$4 sm:$0xff]   ;;  %v3939_v54 = vld [vmem:[#allocation8 + $0xc0] ss:$16 sps:$4 sm:$0xff]  }
  0xe3   :  { %1711 = vmatpush2.bf16.msra.mxu0 %v3846_v55  ;;  %v3944_v55 = vld [vmem:[#allocation8 + $0xa4] ss:$16 sps:$4 sm:$0xff]  }
  0xe4   :  { %1736 = vmatpush1.bf16.msra.mxu1 %v3849_v56  ;;  %1712 = vmatprep.subr.bf16.mxu0 %v3854_v57  ;;  %v3942_v56 = vld [vmem:[#allocation8 + $0xa0] ss:$16 sps:$4 sm:$0xff]   ;;  %v3947_v57 = vld [vmem:[#allocation8 + $0x84] ss:$16 sps:$4 sm:$0xff]  }
  0xe5   :  { %1737 = vmatprep.subr.bf16.mxu1 %v3857_v58  ;;  %v3945_v58 = vld [vmem:[#allocation8 + $0x80] ss:$16 sps:$4 sm:$0xff]  }
  0xe7   :  { %1713 = vmatpush2.bf16.msra.mxu0 %v3852_v59  ;;  %v4008_v59 = vld [vmem:[#allocation8 + $0x2e0] ss:$16 sps:$4 sm:$0xff]  }
  0xe8   :  { %1738 = vmatpush1.bf16.msra.mxu1 %v3855_v60  ;;  %1714 = vmatprep.subr.bf16.mxu0 %v3860_v61  ;;  %v4010_v60 = vld [vmem:[#allocation8 + $0x2e4] ss:$16 sps:$4 sm:$0xff]  }
  0xe9   :  { %1739 = vmatprep.subr.bf16.mxu1 %v3863_v62  ;;  %v3950_v61 = vld [vmem:[#allocation8 + $0x64] ss:$16 sps:$4 sm:$0xff]   ;;  %v4014_v62 = vld [vmem:[#allocation8 + $0x2c0] ss:$16 sps:$4 sm:$0xff]  }
  0xeb   :  { %1715 = vmatpush2.bf16.msra.mxu0 %v3858_v47  ;;  %v4016_v47 = vld [vmem:[#allocation8 + $0x2c4] ss:$16 sps:$4 sm:$0xff]  }
  0xec   :  { %1740 = vmatpush1.bf16.msra.mxu1 %v3861_v6  ;;  %1716 = vmatprep.subr.bf16.mxu0 %v3866_v63  ;;  %v3953_v6 = vld [vmem:[#allocation8 + $0x44] ss:$16 sps:$4 sm:$0xff]   ;;  %v3951_v63 = vld [vmem:[#allocation8 + $0x40] ss:$16 sps:$4 sm:$0xff]  }
  0xed   :  { %1741 = vmatprep.subr.bf16.mxu1 %v3869_v0  ;;  %v4020_v0 = vld [vmem:[#allocation8 + $0x2a0] ss:$16 sps:$4 sm:$0xff]  }
  0xef   :  { %1717 = vmatpush2.bf16.msra.mxu0 %v3864_v1  ;;  %v4022_v1 = vld [vmem:[#allocation8 + $0x2a4] ss:$16 sps:$4 sm:$0xff]  }
  0xf0   :  { %1742 = vmatpush1.bf16.msra.mxu1 %v3867_v2  ;;  %1718 = vmatprep.subr.bf16.mxu0 %v3872_v3  ;;  %v3956_v2 = vld [vmem:[#allocation8 + $0x24] ss:$16 sps:$4 sm:$0xff]   ;;  %v3954_v3 = vld [vmem:[#allocation8 + $0x20] ss:$16 sps:$4 sm:$0xff]  }
  0xf1   :  { %1743 = vmatprep.subr.bf16.mxu1 %v3875_v4  ;;  %v4026_v4 = vld [vmem:[#allocation8 + $0x280] ss:$16 sps:$4 sm:$0xff]  }
  0xf3   :  { %1719 = vmatpush2.bf16.msra.mxu0 %v3870_v35  ;;  %v4028_v35 = vld [vmem:[#allocation8 + $0x284] ss:$16 sps:$4 sm:$0xff]  }
  0xf4   :  { %1744 = vmatpush1.bf16.msra.mxu1 %v3873_v5  ;;  %1720 = vmatprep.subr.bf16.mxu0 %v3878_v8  ;;  %v3959_v5 = vld [vmem:[#allocation8 + $0x4] ss:$16 sps:$4 sm:$0xff]   ;;  %v3957_v8 = vld [vmem:[#allocation8] ss:$16 sps:$4 sm:$0xff]  }
  0xf5   :  { %1745 = vmatprep.subr.bf16.mxu1 %v3881_v9  ;;  %v4032_v9 = vld [vmem:[#allocation8 + $0x260] ss:$16 sps:$4 sm:$0xff]  }
  0xf7   :  { %1721 = vmatpush2.bf16.msra.mxu0 %v3876_v10  ;;  %v4034_v10 = vld [vmem:[#allocation8 + $0x264] ss:$16 sps:$4 sm:$0xff]  }
  0xf8   :  { %1746 = vmatpush1.bf16.msra.mxu1 %v3879_v11  ;;  %1722 = vmatprep.subr.bf16.mxu0 %v3884_v12  ;;  %v3962_v11 = vld [vmem:[#allocation8 + $0x1e4] ss:$16 sps:$4 sm:$0xff]   ;;  %v3960_v12 = vld [vmem:[#allocation8 + $0x1e0] ss:$16 sps:$4 sm:$0xff]  }
  0xf9   :  { %1747 = vmatprep.subr.bf16.mxu1 %v3887_v13  ;;  %v4038_v13 = vld [vmem:[#allocation8 + $0x240] ss:$16 sps:$4 sm:$0xff]  }
  0xfb   :  { %1723 = vmatpush2.bf16.msra.mxu0 %v3882_v14  ;;  %v4040_v14 = vld [vmem:[#allocation8 + $0x244] ss:$16 sps:$4 sm:$0xff]  }
  0xfc   :  { %1748 = vmatpush1.bf16.msra.mxu1 %v3885_v17  ;;  %1774 = vmatprep.subr.bf16.mxu0 %v3893_v19  ;;  %v3965_v17 = vld [vmem:[#allocation8 + $0x1c4] ss:$16 sps:$4 sm:$0xff]  }
  0xfd   :  { %1749 = vmatprep.subr.bf16.mxu1 %v3890_v18 }
  0xfe   :  { %1725 = vmatmul.mubr.bf16.vlgmr.msra.gmra.mxu0 %v4363_v7  ;;  %v3914_v7 = vld [vmem:[#allocation5 + $0x56c] ss:$16 sps:$4 sm:$0xff]  }
  0xff   :  { %1775 = vmatpush1.bf16.msra.mxu0 %v3891_v21  ;;  %1806 = vmatprep.mubr.bf16.mxu0 %v4298_v16  ;;  %v3923_v16 = vld [vmem:[#allocation5 + $0x64c] ss:$16 sps:$4 sm:$0xff]  }
 0x100   :  { %1750 = vmatpush2.bf16.msra.mxu1 %v3888_v20  ;;  %1776 = vmatprep.subr.bf16.mxu0 %v3899_v23  ;;  %v3963_v20 = vld [vmem:[#allocation8 + $0x1c0] ss:$16 sps:$4 sm:$0xff]   ;;  %v3968_v23 = vld [vmem:[#allocation8 + $0x1a4] ss:$16 sps:$4 sm:$0xff]  }
 0x101   :  { %1751 = vmatprep.subr.bf16.mxu1 %v3896_v22 }
 0x103   :  { %1777 = vmatpush1.bf16.msra.mxu0 %v3897_v25  ;;  %v4044_v25 = vld [vmem:[#allocation8 + $0x220] ss:$16 sps:$4 sm:$0xff]  }
 0x104   :  { %1752 = vmatpush2.bf16.msra.mxu1 %v3894_v24  ;;  %1778 = vmatprep.subr.bf16.mxu0 %v3905_v27  ;;  %v4046_v24 = vld [vmem:[#allocation8 + $0x224] ss:$16 sps:$4 sm:$0xff]  }
 0x105   :  { %1753 = vmatprep.subr.bf16.mxu1 %v3902_v26 }
 0x107   :  { %1779 = vmatpush1.bf16.msra.mxu0 %v3903_v29 }
 0x108   :  { %1754 = vmatpush2.bf16.msra.mxu1 %v3900_v28  ;;  %1780 = vmatprep.subr.bf16.mxu0 %v3911_v31  ;;  %v3966_v28 = vld [vmem:[#allocation8 + $0x1a0] ss:$16 sps:$4 sm:$0xff]   ;;  %v3971_v31 = vld [vmem:[#allocation8 + $0x184] ss:$16 sps:$4 sm:$0xff]  }
 0x109   :  { %1755 = vmatprep.subr.bf16.mxu1 %v3908_v30 }
 0x10b   :  { %1781 = vmatpush1.bf16.msra.mxu0 %v3909_v33  ;;  %v4052_v33 = vld [vmem:[#allocation8 + $0x204] ss:$16 sps:$4 sm:$0xff]  }
 0x10c   :  { %1756 = vmatpush2.bf16.msra.mxu1 %v3906_v32  ;;  %1782 = vmatprep.subr.bf16.mxu0 %v3917_v51  ;;  %v4050_v32 = vld [vmem:[#allocation8 + $0x200] ss:$16 sps:$4 sm:$0xff]  }
 0x10d   :  { %1757 = vmatprep.subr.bf16.mxu1 %v3914_v7  ;;  %v3969_v7 = vld [vmem:[#allocation8 + $0x180] ss:$16 sps:$4 sm:$0xff]  }
 0x10e   :  { %v4056_v51 = vld [vmem:[#allocation8 + $0x3e0] ss:$16 sps:$4 sm:$0xff]  }
 0x10f   :  { %1783 = vmatpush1.bf16.msra.mxu0 %v3915_v36  ;;  %v3974_v36 = vld [vmem:[#allocation8 + $0x164] ss:$16 sps:$4 sm:$0xff]  }
 0x110   :  { %1758 = vmatpush2.bf16.msra.mxu1 %v3912_v34  ;;  %1784 = vmatprep.subr.bf16.mxu0 %v3923_v16  ;;  %v4058_v34 = vld [vmem:[#allocation8 + $0x3e4] ss:$16 sps:$4 sm:$0xff]   ;;  %v3972_v16 = vld [vmem:[#allocation8 + $0x160] ss:$16 sps:$4 sm:$0xff]  }
 0x111   :  { %1759 = vmatprep.subr.bf16.mxu1 %v3920_v37  ;;  %v4061_v37 = vld [vmem:[#allocation8 + $0x3c4] ss:$16 sps:$4 sm:$0xff]  }
 0x113   :  { %1785 = vmatpush1.bf16.msra.mxu0 %v3921_v39  ;;  %v3977_v39 = vld [vmem:[#allocation8 + $0x144] ss:$16 sps:$4 sm:$0xff]  }
 0x114   :  { %1760 = vmatpush2.bf16.msra.mxu1 %v3918_v38  ;;  %1786 = vmatprep.subr.bf16.mxu0 %v3929_v41  ;;  %v4059_v38 = vld [vmem:[#allocation8 + $0x3c0] ss:$16 sps:$4 sm:$0xff]  }
 0x115   :  { %1761 = vmatprep.subr.bf16.mxu1 %v3926_v40  ;;  %v4064_v40 = vld [vmem:[#allocation8 + $0x3a4] ss:$16 sps:$4 sm:$0xff]   ;;  %v3975_v41 = vld [vmem:[#allocation8 + $0x140] ss:$16 sps:$4 sm:$0xff]  }
 0x117   :  { %1787 = vmatpush1.bf16.msra.mxu0 %v3927_v43  ;;  %v3980_v43 = vld [vmem:[#allocation8 + $0x124] ss:$16 sps:$4 sm:$0xff]  }
 0x118   :  { %1762 = vmatpush2.bf16.msra.mxu1 %v3924_v42  ;;  %1788 = vmatprep.subr.bf16.mxu0 %v3935_v45  ;;  %v4062_v42 = vld [vmem:[#allocation8 + $0x3a0] ss:$16 sps:$4 sm:$0xff]  }
 0x119   :  { %1763 = vmatprep.subr.bf16.mxu1 %v3932_v44  ;;  %v4067_v44 = vld [vmem:[#allocation8 + $0x384] ss:$16 sps:$4 sm:$0xff]   ;;  %v3978_v45 = vld [vmem:[#allocation8 + $0x120] ss:$16 sps:$4 sm:$0xff]  }
 0x11b   :  { %1789 = vmatpush1.bf16.msra.mxu0 %v3933_v48  ;;  %v3983_v48 = vld [vmem:[#allocation8 + $0x104] ss:$16 sps:$4 sm:$0xff]  }
 0x11c   :  { %1764 = vmatpush2.bf16.msra.mxu1 %v3930_v46  ;;  %2613 = vmatprep.subr.bf16.mxu0 %v3938_v49  ;;  %v4065_v46 = vld [vmem:[#allocation8 + $0x380] ss:$16 sps:$4 sm:$0xff]   ;;  %v4070_v49 = vld [vmem:[#allocation8 + $0x364] ss:$16 sps:$4 sm:$0xff]  }
 0x11d   :  { %2654 = vmatprep.subr.bf16.mxu1 %v4010_v60 }
 0x11e   :  { %1807 = vmatmul.mubr.bf16.vlgmr.msra.gmra.mxu0 %v4160_v53  ;;  %v3986_v53 = vld [vmem:[#allocation8 + $0xec] ss:$16 sps:$4 sm:$0xff]  }
 0x11f   :  { %1766 = vmatmul.mubr.bf16.vlgmr.msra.gmra.mxu1 %v4378_v15  ;;  %2614 = vmatpush1.bf16.msra.mxu0 %v3936_v50  ;;  %v3948_v15 = vld [vmem:[#allocation8 + $0x60] ss:$16 sps:$4 sm:$0xff]  }
 0x120   :  { %2615 = vmatprep.subr.bf16.mxu0 %v3941_v52  ;;  %2655 = vmatpush1.bf16.msra.mxu1 %v4008_v59  ;;  %v3981_v50 = vld [vmem:[#allocation8 + $0x100] ss:$16 sps:$4 sm:$0xff]  }
 0x121   :  { %2656 = vmatprep.subr.bf16.mxu1 %v4016_v47  ;;  %v4068_v52 = vld [vmem:[#allocation8 + $0x360] ss:$16 sps:$4 sm:$0xff]   ;;  %v4082_v47 = vld [vmem:[#allocation8 + $0x2ec] ss:$16 sps:$4 sm:$0xff]  }
 0x122   :  { %v4074_v59 = vld [vmem:[#allocation8 + $0x320] ss:$16 sps:$4 sm:$0xff]  }
 0x123   :  { %2616 = vmatpush1.bf16.msra.mxu0 %v3939_v54  ;;  %v4073_v54 = vld [vmem:[#allocation8 + $0x344] ss:$16 sps:$4 sm:$0xff]  }
 0x124   :  { %2617 = vmatprep.subr.bf16.mxu0 %v3944_v55  ;;  %2657 = vmatpush1.bf16.msra.mxu1 %v4014_v62  ;;  %v4071_v55 = vld [vmem:[#allocation8 + $0x340] ss:$16 sps:$4 sm:$0xff]  }
 0x125   :  { %2658 = vmatprep.subr.bf16.mxu1 %v4022_v1  ;;  %v4077_v62 = vld [vmem:[#allocation8 + $0x300] ss:$16 sps:$4 sm:$0xff]   ;;  %v4398_v1 = vld [vmem:[#allocation7] sm:$0xf] }
 0x127   :  { %2618 = vmatpush1.bf16.msra.mxu0 %v3942_v56 }
 0x128   :  { %2619 = vmatprep.subr.bf16.mxu0 %v3947_v57  ;;  %2659 = vmatpush1.bf16.msra.mxu1 %v4020_v0 }
 0x129   :  { %2660 = vmatprep.subr.bf16.mxu1 %v4028_v35 }
 0x12b   :  { %2620 = vmatpush1.bf16.msra.mxu0 %v3945_v58  ;;  %v4076_v58 = vld [vmem:[#allocation8 + $0x324] ss:$16 sps:$4 sm:$0xff]  }
 0x12c   :  { %2621 = vmatprep.subr.bf16.mxu0 %v3950_v61  ;;  %2661 = vmatpush1.bf16.msra.mxu1 %v4026_v4 }
 0x12d   :  { %2662 = vmatprep.subr.bf16.mxu1 %v4034_v10 }
 0x12f   :  { %2622 = vmatpush1.bf16.msra.mxu0 %v3948_v15  ;;  %v4079_v15 = vld [vmem:[#allocation8 + $0x304] ss:$16 sps:$4 sm:$0xff]  }
 0x130   :  { %2623 = vmatprep.subr.bf16.mxu0 %v3953_v6  ;;  %2663 = vmatpush1.bf16.msra.mxu1 %v4032_v9  ;;  %v322_v6 = vlaneseq }
 0x131   :  { %2664 = vmatprep.subr.bf16.mxu1 %v4040_v14 }
 0x133   :  { %2624 = vmatpush1.bf16.msra.mxu0 %v3951_v63  ;;  %v4395_v63 = vshrl.u32 %v322_v6, 7 }
 0x134   :  { %2625 = vmatprep.subr.bf16.mxu0 %v3956_v2  ;;  %2665 = vmatpush1.bf16.msra.mxu1 %v4038_v13 }
 0x135   :  { %2666 = vmatprep.subr.bf16.mxu1 %v4046_v24  ;;  %v324_v0 = vsub.s32 0, %v4395_v63  ;;  %v328_v2 = vsub.s32 1, %v4395_v63 }
 0x137   :  { %2626 = vmatpush1.bf16.msra.mxu0 %v3954_v3  ;;  %v325_v3 = vrot.slane %v4398_v1, %v324_v0  ;;  %v329_v4 = vrot.slane %v4398_v1, %v328_v2 }
 0x138   :  { %2627 = vmatprep.subr.bf16.mxu0 %v3959_v5  ;;  %2667 = vmatpush1.bf16.msra.mxu1 %v4044_v25 }
 0x139   :  { %2668 = vmatprep.subr.bf16.mxu1 %v4052_v33  ;;  %v4001_v33 = vld [vmem:[#allocation8 + $0x4c] ss:$16 sps:$4 sm:$0xff]  }
 0x13b   :  { %2628 = vmatpush1.bf16.msra.mxu0 %v3957_v8 }
 0x13c   :  { %2629 = vmatprep.subr.bf16.mxu0 %v3962_v11  ;;  %2669 = vmatpush1.bf16.msra.mxu1 %v4050_v32  ;;  %v3996_v32 = vld [vmem:[#allocation8 + $0x68] ss:$16 sps:$4 sm:$0xff]  }
 0x13d   :  { %2670 = vmatprep.subr.bf16.mxu1 %v4058_v34 }
 0x13e   :  { %v4387_v18 = vpop.f32.mrf.mxu0 }
 0x13f   :  { %v4389_v19 = vpop.f32.mrf.mxu1  ;;  %2630 = vmatpush2.bf16.msra.mxu0 %v3960_v12  ;;  %v1522_v35 = vadd.f32 %v4387_v18, %v325_v3  ;;  %v3989_v18 = vld [vmem:[#allocation8 + $0xcc] ss:$16 sps:$4 sm:$0xff]  }
 0x140   :  { %v4391_v21 = vpop.f32.mrf.mxu0  ;;  %2631 = vmatprep.subr.bf16.mxu0 %v3965_v17  ;;  %2671 = vmatpush2.bf16.msra.mxu1 %v4056_v51  ;;  %v4004_v51 = vld [vmem:[#allocation8 + $0x2c] ss:$16 sps:$4 sm:$0xff]  }
 0x141   :  { %v4393_v22 = vpop.f32.mrf.mxu1  ;;  %2672 = vmatprep.subr.bf16.mxu1 %v4061_v37  ;;  %v1524_v5 = vadd.f32 %v4391_v21, %v329_v4  ;;  %v1563_v8 = vadd.f32 %v4389_v19, %v1522_v35  ;;  %v3987_v19 = vld [vmem:[#allocation8 + $0xc8] ss:$16 sps:$4 sm:$0xff]   ;;  %v3992_v21 = vld [vmem:[#allocation8 + $0xac] ss:$16 sps:$4 sm:$0xff]  }
 0x142   :  { %v1525_v26 = vpop.f32.mrf.mxu0 }
 0x143   :  { %v1566_v27 = vpop.f32.mrf.mxu1  ;;  %2632 = vmatpush2.bf16.msra.mxu0 %v3963_v20  ;;  %v1565_v10 = vadd.f32 %v4393_v22, %v1524_v5  ;;  %v3990_v22 = vld [vmem:[#allocation8 + $0xa8] ss:$16 sps:$4 sm:$0xff]  }
 0x144   :  { %v1526_v29 = vpop.f32.mrf.mxu0  ;;  %2633 = vmatprep.subr.bf16.mxu0 %v3968_v23  ;;  %2673 = vmatpush2.bf16.msra.mxu1 %v4059_v38  ;;  %v3984_v27 = vld [vmem:[#allocation8 + $0xe8] ss:$16 sps:$4 sm:$0xff]  }
 0x145   :  { %v1567_v30 = vpop.f32.mrf.mxu1  ;;  %2674 = vmatprep.subr.bf16.mxu1 %v4064_v40  ;;  %v3995_v29 = vld [vmem:[#allocation8 + $0x8c] ss:$16 sps:$4 sm:$0xff]  }
 0x146   :  { %v3993_v30 = vld [vmem:[#allocation8 + $0x88] ss:$16 sps:$4 sm:$0xff]  }
 0x147   :  { %2634 = vmatpush2.bf16.msra.mxu0 %v3966_v28 }
 0x148   :  { %2635 = vmatprep.subr.bf16.mxu0 %v3971_v31  ;;  %2675 = vmatpush2.bf16.msra.mxu1 %v4062_v42  ;;  %v3998_v31 = vld [vmem:[#allocation8 + $0x6c] ss:$16 sps:$4 sm:$0xff]   ;;  %v4011_v42 = vld [vmem:[#allocation8 + $0x1e8] ss:$16 sps:$4 sm:$0xff]  }
 0x149   :  { %2676 = vmatprep.subr.bf16.mxu1 %v4067_v44  ;;  %v4017_v44 = vld [vmem:[#allocation8 + $0x1c8] ss:$16 sps:$4 sm:$0xff]  }
 0x14b   :  { %2636 = vmatpush2.bf16.msra.mxu0 %v3969_v7  ;;  %v3999_v7 = vld [vmem:[#allocation8 + $0x48] ss:$16 sps:$4 sm:$0xff]  }
 0x14c   :  { %2637 = vmatprep.subr.bf16.mxu0 %v3974_v36  ;;  %2677 = vmatpush2.bf16.msra.mxu1 %v4065_v46  ;;  %v4002_v36 = vld [vmem:[#allocation8 + $0x28] ss:$16 sps:$4 sm:$0xff]  }
 0x14d   :  { %2678 = vmatprep.subr.bf16.mxu1 %v4070_v49  ;;  %v4023_v46 = vld [vmem:[#allocation8 + $0x1a8] ss:$16 sps:$4 sm:$0xff]  }
 0x14e   :  { %v4029_v49 = vld [vmem:[#allocation8 + $0x188] ss:$16 sps:$4 sm:$0xff]  }
 0x14f   :  { %2638 = vmatpush2.bf16.msra.mxu0 %v3972_v16  ;;  %v4007_v16 = vld [vmem:[#allocation8 + $0xc] ss:$16 sps:$4 sm:$0xff]  }
 0x150   :  { %2639 = vmatprep.subr.bf16.mxu0 %v3977_v39  ;;  %2679 = vmatpush2.bf16.msra.mxu1 %v4068_v52  ;;  %v4005_v39 = vld [vmem:[#allocation8 + $0x8] ss:$16 sps:$4 sm:$0xff]  }
 0x151   :  { %2680 = vmatprep.subr.bf16.mxu1 %v4073_v54  ;;  %v4035_v52 = vld [vmem:[#allocation8 + $0x168] ss:$16 sps:$4 sm:$0xff]  }
 0x152   :  { %v4041_v54 = vld [vmem:[#allocation8 + $0x148] ss:$16 sps:$4 sm:$0xff]  }
 0x153   :  { %2640 = vmatpush2.bf16.msra.mxu0 %v3975_v41  ;;  %v4013_v41 = vld [vmem:[#allocation8 + $0x1ec] ss:$16 sps:$4 sm:$0xff]  }
 0x154   :  { %2641 = vmatprep.subr.bf16.mxu0 %v3980_v43  ;;  %2681 = vmatpush2.bf16.msra.mxu1 %v4071_v55  ;;  %v4019_v43 = vld [vmem:[#allocation8 + $0x1cc] ss:$16 sps:$4 sm:$0xff]  }
 0x155   :  { %2682 = vmatprep.subr.bf16.mxu1 %v4076_v58  ;;  %v4049_v55 = vld [vmem:[#allocation8 + $0x12c] ss:$16 sps:$4 sm:$0xff]  }
 0x157   :  { %2642 = vmatpush2.bf16.msra.mxu0 %v3978_v45  ;;  %v4025_v45 = vld [vmem:[#allocation8 + $0x1ac] ss:$16 sps:$4 sm:$0xff]  }
 0x158   :  { %2643 = vmatprep.subr.bf16.mxu0 %v3983_v48  ;;  %2683 = vmatpush2.bf16.msra.mxu1 %v4074_v59  ;;  %v4031_v48 = vld [vmem:[#allocation8 + $0x18c] ss:$16 sps:$4 sm:$0xff]  }
 0x159   :  { %2684 = vmatprep.subr.bf16.mxu1 %v4079_v15  ;;  %v4055_v59 = vld [vmem:[#allocation8 + $0x10c] ss:$16 sps:$4 sm:$0xff]  }
 0x15b   :  { %2644 = vmatpush2.bf16.msra.mxu0 %v3981_v50  ;;  %v4037_v50 = vld [vmem:[#allocation8 + $0x16c] ss:$16 sps:$4 sm:$0xff]  }
 0x15c   :  { %2695 = vmatprep.subr.bf16.mxu0 %v3986_v53  ;;  %2685 = vmatpush2.bf16.msra.mxu1 %v4077_v62  ;;  %v4043_v53 = vld [vmem:[#allocation8 + $0x14c] ss:$16 sps:$4 sm:$0xff]   ;;  %v332_v62 = vsub.s32 2, %v4395_v63 }
 0x15d   :  { %2736 = vmatprep.subr.bf16.mxu1 %v4082_v47  ;;  %v336_v47 = vsub.s32 3, %v4395_v63 }
 0x15e   :  { %v333_v6 = vrot.slane %v4398_v1, %v332_v62 }
 0x15f   :  { %v1644_v56 = vpop.f32.mrf.mxu1  ;;  %v337_v3 = vrot.slane %v4398_v1, %v336_v47  ;;  %v4080_v1 = vld [vmem:[#allocation8 + $0x2e8] ss:$16 sps:$4 sm:$0xff]  }
 0x161   :  { %v1646_v57 = vpop.f32.mrf.mxu1 }
 0x163   :  { %v1648_v60 = vpop.f32.mrf.mxu1 }
 0x165   :  { %v1649_v61 = vpop.f32.mrf.mxu1 }
 0x166   :  { %v4053_v61 = vld [vmem:[#allocation8 + $0x108] ss:$16 sps:$4 sm:$0xff]  }
 0x17e   :  { %v1603_v9 = vpop.f32.mrf.mxu0 }
 0x17f   :  { %v1604_v11 = vadd.f32 %v1603_v9, %v1563_v8 }
 0x180   :  { %v1605_v12 = vpop.f32.mrf.mxu0 }
 0x181   :  { %v1645_v13 = vadd.f32 %v1644_v56, %v1604_v11  ;;  %v1606_v14 = vadd.f32 %v1605_v12, %v1565_v10 }
 0x182   :  { %v1607_v17 = vpop.f32.mrf.mxu0 }
 0x183   :  { %v1647_v20 = vadd.f32 %v1646_v57, %v1606_v14  ;;  %v1815_v23 = vmax.f32 %v1645_v13, 0.0  ;;  %v4047_v57 = vld [vmem:[#allocation8 + $0x128] ss:$16 sps:$4 sm:$0xff]  }
 0x184   :  { %v1608_v24 = vpop.f32.mrf.mxu0 }
 0x185   :  { %v1816_v25 = vmax.f32 %v1647_v20, 0.0  ;;  %v4411_v28 = vpack.c.bf16 %v1815_v23, %v1815_v23 }
 0x187   :  { %v1820_v26 = vpack.c.bf16 %v1816_v25, %v1816_v25 }
 0x189   :  { %2645 = vmatprep.mubr.bf16.mxu0 %v1820_v26 }
 0x18a   :  { %2646 = vmatmul.mubr.bf16.vlgmr.msra.gmra.mxu0 %v4411_v28 }
 0x18b   :  { %2696 = vmatpush1.bf16.msra.mxu0 %v3984_v27  ;;  %2727 = vmatprep.mubr.bf16.mxu0 %v1820_v26 }
 0x18c   :  { %2697 = vmatprep.subr.bf16.mxu0 %v3989_v18 }
 0x18f   :  { %2698 = vmatpush1.bf16.msra.mxu0 %v3987_v19 }
 0x190   :  { %2699 = vmatprep.subr.bf16.mxu0 %v3992_v21  ;;  %v4085_v21 = vld [vmem:[#allocation8 + $0x2cc] ss:$16 sps:$4 sm:$0xff]  }
 0x193   :  { %2700 = vmatpush1.bf16.msra.mxu0 %v3990_v22  ;;  %v4083_v22 = vld [vmem:[#allocation8 + $0x2c8] ss:$16 sps:$4 sm:$0xff]  }
 0x194   :  { %2701 = vmatprep.subr.bf16.mxu0 %v3995_v29  ;;  %v4088_v29 = vld [vmem:[#allocation8 + $0x2ac] ss:$16 sps:$4 sm:$0xff]  }
 0x197   :  { %2702 = vmatpush1.bf16.msra.mxu0 %v3993_v30  ;;  %v4086_v30 = vld [vmem:[#allocation8 + $0x2a8] ss:$16 sps:$4 sm:$0xff]  }
 0x198   :  { %2703 = vmatprep.subr.bf16.mxu0 %v3998_v31  ;;  %v4091_v31 = vld [vmem:[#allocation8 + $0x28c] ss:$16 sps:$4 sm:$0xff]  }
 0x19b   :  { %2704 = vmatpush1.bf16.msra.mxu0 %v3996_v32  ;;  %v4089_v32 = vld [vmem:[#allocation8 + $0x288] ss:$16 sps:$4 sm:$0xff]  }
 0x19c   :  { %2705 = vmatprep.subr.bf16.mxu0 %v4001_v33  ;;  %v4094_v33 = vld [vmem:[#allocation8 + $0x26c] ss:$16 sps:$4 sm:$0xff]  }
 0x19f   :  { %v1685_v34 = vpop.f32.mrf.mxu1  ;;  %2706 = vmatpush1.bf16.msra.mxu0 %v3999_v7  ;;  %v4092_v7 = vld [vmem:[#allocation8 + $0x268] ss:$16 sps:$4 sm:$0xff]  }
 0x1a0   :  { %2707 = vmatprep.subr.bf16.mxu0 %v4004_v51  ;;  %v1686_v4 = vadd.f32 %v1685_v34, %v333_v6  ;;  %v4097_v51 = vld [vmem:[#allocation8 + $0x24c] ss:$16 sps:$4 sm:$0xff]   ;;  %v4095_v34 = vld [vmem:[#allocation8 + $0x248] ss:$16 sps:$4 sm:$0xff]  }
 0x1a1   :  { %v1687_v37 = vpop.f32.mrf.mxu1  ;;  %v4122_v6 = vld [vmem:[#allocation8 + $0x328] ss:$16 sps:$4 sm:$0xff]  }
 0x1a2   :  { %v1688_v35 = vadd.f32 %v1687_v37, %v337_v3  ;;  %v4098_v37 = vld [vmem:[#allocation8 + $0x228] ss:$16 sps:$4 sm:$0xff]  }
 0x1a3   :  { %v1689_v38 = vpop.f32.mrf.mxu1  ;;  %2708 = vmatpush1.bf16.msra.mxu0 %v4002_v36  ;;  %v4100_v36 = vld [vmem:[#allocation8 + $0x22c] ss:$16 sps:$4 sm:$0xff]  }
 0x1a4   :  { %2709 = vmatprep.subr.bf16.mxu0 %v4007_v16  ;;  %v4103_v16 = vld [vmem:[#allocation8 + $0x20c] ss:$16 sps:$4 sm:$0xff]   ;;  %v4101_v38 = vld [vmem:[#allocation8 + $0x208] ss:$16 sps:$4 sm:$0xff]  }
 0x1a5   :  { %v1690_v40 = vpop.f32.mrf.mxu1  ;;  %v4137_v3 = vld [vmem:[#allocation10 + $0x18] sm:$0xff]  }
 0x1a6   :  { %v4104_v40 = vld [vmem:[#allocation8 + $0x3e8] ss:$16 sps:$4 sm:$0xff]  }
 0x1a7   :  { %2710 = vmatpush1.bf16.msra.mxu0 %v4005_v39  ;;  %v4106_v39 = vld [vmem:[#allocation8 + $0x3ec] ss:$16 sps:$4 sm:$0xff]  }
 0x1a8   :  { %2711 = vmatprep.subr.bf16.mxu0 %v4013_v41  ;;  %v4109_v41 = vld [vmem:[#allocation8 + $0x3cc] ss:$16 sps:$4 sm:$0xff]  }
 0x1ab   :  { %2712 = vmatpush2.bf16.msra.mxu0 %v4011_v42  ;;  %v4107_v42 = vld [vmem:[#allocation8 + $0x3c8] ss:$16 sps:$4 sm:$0xff]  }
 0x1ac   :  { %2713 = vmatprep.subr.bf16.mxu0 %v4019_v43  ;;  %v4112_v43 = vld [vmem:[#allocation8 + $0x3ac] ss:$16 sps:$4 sm:$0xff]  }
 0x1af   :  { %2714 = vmatpush2.bf16.msra.mxu0 %v4017_v44  ;;  %v4110_v44 = vld [vmem:[#allocation8 + $0x3a8] ss:$16 sps:$4 sm:$0xff]  }
 0x1b0   :  { %2715 = vmatprep.subr.bf16.mxu0 %v4025_v45  ;;  %v4115_v45 = vld [vmem:[#allocation8 + $0x38c] ss:$16 sps:$4 sm:$0xff]  }
 0x1b3   :  { %2716 = vmatpush2.bf16.msra.mxu0 %v4023_v46  ;;  %v4128_v46 = vld [vmem:[#allocation10 + $0x78] sm:$0xff]  }
 0x1b4   :  { %2717 = vmatprep.subr.bf16.mxu0 %v4031_v48  ;;  %v4129_v48 = vld [vmem:[#allocation10 + $0x38] sm:$0xff]  }
 0x1b7   :  { %2718 = vmatpush2.bf16.msra.mxu0 %v4029_v49  ;;  %v4130_v49 = vld [vmem:[#allocation10 + $0x70] sm:$0xff]  }
 0x1b8   :  { %2719 = vmatprep.subr.bf16.mxu0 %v4037_v50  ;;  %v4113_v50 = vld [vmem:[#allocation8 + $0x388] ss:$16 sps:$4 sm:$0xff]  }
 0x1bb   :  { %2720 = vmatpush2.bf16.msra.mxu0 %v4035_v52  ;;  %v4131_v52 = vld [vmem:[#allocation10 + $0x30] sm:$0xff]  }
 0x1bc   :  { %2721 = vmatprep.subr.bf16.mxu0 %v4043_v53  ;;  %v4118_v53 = vld [vmem:[#allocation8 + $0x36c] ss:$16 sps:$4 sm:$0xff]  }
 0x1be   :  { %v1726_v56 = vpop.f32.mrf.mxu0 }
 0x1bf   :  { %2722 = vmatpush2.bf16.msra.mxu0 %v4041_v54  ;;  %v1727_v5 = vadd.f32 %v1726_v56, %v1686_v4  ;;  %v4132_v54 = vld [vmem:[#allocation10 + $0x68] sm:$0xff]  }
 0x1c0   :  { %v1728_v58 = vpop.f32.mrf.mxu0  ;;  %2723 = vmatprep.subr.bf16.mxu0 %v4049_v55  ;;  %v4116_v55 = vld [vmem:[#allocation8 + $0x368] ss:$16 sps:$4 sm:$0xff]   ;;  %v4127_v4 = vld [vmem:[#allocation8 + $0x30c] ss:$16 sps:$4 sm:$0xff]  }
 0x1c1   :  { %v1729_v10 = vadd.f32 %v1728_v58, %v1688_v35  ;;  %v4133_v56 = vld [vmem:[#allocation10 + $0x28] sm:$0xff]   ;;  %v4134_v58 = vld [vmem:[#allocation10 + $0x60] sm:$0xff]   ;;  %v4138_v35 = vld [vmem:[#allocation10 + $0x50] sm:$0xff]  }
 0x1c2   :  { %v1730_v60 = vpop.f32.mrf.mxu0 }
 0x1c3   :  { %2724 = vmatpush2.bf16.msra.mxu0 %v4047_v57  ;;  %v4121_v57 = vld [vmem:[#allocation8 + $0x34c] ss:$16 sps:$4 sm:$0xff]   ;;  %v4135_v60 = vld [vmem:[#allocation10 + $0x20] sm:$0xff]  }
 0x1c4   :  { %v1731_v15 = vpop.f32.mrf.mxu0  ;;  %2725 = vmatprep.subr.bf16.mxu0 %v4055_v59  ;;  %v4119_v59 = vld [vmem:[#allocation8 + $0x348] ss:$16 sps:$4 sm:$0xff]  }
 0x1c5   :  { %v4136_v15 = vld [vmem:[#allocation10 + $0x58] sm:$0xff]  }
 0x1c7   :  { %2726 = vmatpush2.bf16.msra.mxu0 %v4053_v61  ;;  %v4124_v61 = vld [vmem:[#allocation8 + $0x32c] ss:$16 sps:$4 sm:$0xff]  }
 0x1c8   :  { %3538 = vmatprep.subr.bf16.mxu0 %v4128_v46 }
 0x1ca   :  { %2728 = vmatmul.mubr.bf16.vlgmr.msra.gmra.mxu0 %v4411_v28 }
 0x1cb   :  { %3539 = vmatpush3.bf16.msra.mxu0 %v4129_v48 }
 0x1cc   :  { %3540 = vmatprep.subr.bf16.mxu0 %v4130_v49 }
 0x1cf   :  { %3541 = vmatpush3.bf16.msra.mxu0 %v4131_v52 }
 0x1d0   :  { %3542 = vmatprep.subr.bf16.mxu0 %v4132_v54 }
 0x1d3   :  { %3543 = vmatpush3.bf16.msra.mxu0 %v4133_v56 }
 0x1d4   :  { %3544 = vmatprep.subr.bf16.mxu0 %v4134_v58 }
 0x1d7   :  { %3545 = vmatpush3.bf16.msra.mxu0 %v4135_v60 }
 0x1d8   :  { %3546 = vmatprep.subr.bf16.mxu0 %v4136_v15 }
 0x1db   :  { %3547 = vmatpush3.bf16.msra.mxu0 %v4137_v3 }
 0x1dc   :  { %3548 = vmatprep.subr.bf16.mxu0 %v4138_v35 }
 0x1de   :  { %v1808_v9 = vpop.f32.mrf.mxu0 }
 0x1df   :  { %v1767_v8 = vpop.f32.mrf.mxu1 }
 0x1e0   :  { %v1768_v11 = vadd.f32 %v1767_v8, %v1727_v5  ;;  %v1810_v13 = vpop.f32.mrf.mxu0  ;;  %v4125_v5 = vld [vmem:[#allocation8 + $0x308] ss:$16 sps:$4 sm:$0xff]   ;;  %v4139_v8 = vld [vmem:[#allocation10 + $0x10] sm:$0xff]  }
 0x1e1   :  { %v1769_v12 = vpop.f32.mrf.mxu1  ;;  %3549 = vmatpush3.bf16.msra.mxu0 %v4139_v8 }
 0x1e2   :  { %v1809_v14 = vadd.f32 %v1808_v9, %v1768_v11  ;;  %v1770_v17 = vadd.f32 %v1769_v12, %v1729_v10  ;;  %v1812_v23 = vpop.f32.mrf.mxu0  ;;  %v4140_v9 = vld [vmem:[#allocation10 + $0x48] sm:$0xff]   ;;  %v4142_v11 = vld [vmem:[#allocation10 + $0x40] sm:$0xff]  }
 0x1e3   :  { %v1771_v20 = vpop.f32.mrf.mxu1  ;;  %v4141_v10 = vld [vmem:[#allocation10 + $0x8] sm:$0xff]   ;;  %3550 = vmatprep.subr.bf16.mxu0 %v4140_v9  ;;  %v4143_v12 = vld [vmem:[#allocation10] sm:$0xff]  }
 0x1e4   :  { %v1811_v24 = vadd.f32 %v1810_v13, %v1770_v17  ;;  %v1817_v25 = vmax.f32 %v1809_v14, 0.0  ;;  %v1813_v27 = vpop.f32.mrf.mxu0  ;;  %v4144_v13 = vld [vmem:[#allocation10 + $0xf8] sm:$0xff]   ;;  %v4146_v17 = vld [vmem:[#allocation10 + $0xf0] sm:$0xff]   ;;  %v4148_v23 = vld [vmem:[#allocation10 + $0xe8] sm:$0xff]  }
 0x1e5   :  { %v1772_v26 = vpop.f32.mrf.mxu1  ;;  %3551 = vmatpush3.bf16.msra.mxu0 %v4141_v10  ;;  %v4145_v14 = vld [vmem:[#allocation10 + $0xb8] sm:$0xff]   ;;  %v4147_v20 = vld [vmem:[#allocation10 + $0xb0] sm:$0xff]  }
 0x1e6   :  { %v1818_v28 = vmax.f32 %v1811_v24, 0.0  ;;  %v4423_v19 = vpack.c.bf16 %v1817_v25, %v1817_v25  ;;  %3552 = vmatprep.subr.bf16.mxu0 %v4142_v11  ;;  %v4149_v24 = vld [vmem:[#allocation10 + $0xa8] sm:$0xff]   ;;  %v4150_v25 = vld [vmem:[#allocation10 + $0xe0] sm:$0xff]   ;;  %v4152_v27 = vld [vmem:[#allocation10 + $0xd8] sm:$0xff]  }
 0x1e7   :  { %v4151_v26 = vld [vmem:[#allocation10 + $0xa0] sm:$0xff]  }
 0x1e8   :  { %v1822_v18 = vpack.c.bf16 %v1818_v28, %v1818_v28  ;;  %v4153_v28 = vld [vmem:[#allocation10 + $0x98] sm:$0xff]  }
 0x1e9   :  { %3553 = vmatpush3.bf16.msra.mxu0 %v4143_v12 }
 0x1ea   :  { %2686 = vmatprep.mubr.bf16.mxu1 %v1822_v18 }
 0x1eb   :  { %2687 = vmatmul.mubr.bf16.vlgmr.msra.gmra.mxu1 %v4423_v19 }
 0x1ec   :  { %2737 = vmatpush1.bf16.msra.mxu1 %v4080_v1  ;;  %2768 = vmatprep.mubr.bf16.mxu1 %v1822_v18  ;;  %v4154_v18 = vld [vmem:[#allocation10 + $0xd0] sm:$0xff]  }
 0x1ed   :  { %2738 = vmatprep.subr.bf16.mxu1 %v4085_v21  ;;  %v4155_v1 = vld [vmem:[#allocation10 + $0x90] sm:$0xff]  }
 0x1f0   :  { %2739 = vmatpush1.bf16.msra.mxu1 %v4083_v22 }
 0x1f1   :  { %2740 = vmatprep.subr.bf16.mxu1 %v4088_v29 }
 0x1f4   :  { %2741 = vmatpush1.bf16.msra.mxu1 %v4086_v30  ;;  %v4156_v30 = vld [vmem:[#allocation10 + $0xc8] sm:$0xff]  }
 0x1f5   :  { %2742 = vmatprep.subr.bf16.mxu1 %v4091_v31  ;;  %v4157_v31 = vld [vmem:[#allocation10 + $0x88] sm:$0xff]  }
 0x1f8   :  { %2743 = vmatpush1.bf16.msra.mxu1 %v4089_v32  ;;  %v4158_v32 = vld [vmem:[#allocation10 + $0xc0] sm:$0xff]  }
 0x1f9   :  { %2744 = vmatprep.subr.bf16.mxu1 %v4094_v33  ;;  %v4159_v33 = vld [vmem:[#allocation10 + $0x80] sm:$0xff]  }
 0x1fc   :  { %2745 = vmatpush1.bf16.msra.mxu1 %v4092_v7 }
 0x1fd   :  { %2746 = vmatprep.subr.bf16.mxu1 %v4097_v51 }
 0x200   :  { %2747 = vmatpush1.bf16.msra.mxu1 %v4095_v34 }
 0x201   :  { %2748 = vmatprep.subr.bf16.mxu1 %v4100_v36 }
 0x204   :  { %2749 = vmatpush1.bf16.msra.mxu1 %v4098_v37  ;;  %v1951_v37 = vld [vmem:[%s4448_s4] sm:$0xf] }
 0x205   :  { %2750 = vmatprep.subr.bf16.mxu1 %v4103_v16  ;;  %v1956_v16 = vrot.slane %v1951_v37, %v324_v0  ;;  %v1964_v0 = vrot.slane %v1951_v37, %v332_v62 }
 0x208   :  { %2751 = vmatpush1.bf16.msra.mxu1 %v4101_v38  ;;  %v1960_v38 = vrot.slane %v1951_v37, %v328_v2  ;;  %v1968_v2 = vrot.slane %v1951_v37, %v336_v47  ;;  %v3505_v47 = vld [vmem:[%s4450_s6] ss:$0 sm:$0xff] }
 0x209   :  { %2752 = vmatprep.subr.bf16.mxu1 %v4106_v39 }
 0x20c   :  { %2753 = vmatpush2.bf16.msra.mxu1 %v4104_v40 }
 0x20d   :  { %2754 = vmatprep.subr.bf16.mxu1 %v4109_v41 }
 0x210   :  { %2755 = vmatpush2.bf16.msra.mxu1 %v4107_v42 }
 0x211   :  { %2756 = vmatprep.subr.bf16.mxu1 %v4112_v43 }
 0x214   :  { %2757 = vmatpush2.bf16.msra.mxu1 %v4110_v44 }
 0x215   :  { %2758 = vmatprep.subr.bf16.mxu1 %v4115_v45 }
 0x218   :  { %2759 = vmatpush2.bf16.msra.mxu1 %v4113_v50 }
 0x219   :  { %2760 = vmatprep.subr.bf16.mxu1 %v4118_v53 }
 0x21c   :  { %2761 = vmatpush2.bf16.msra.mxu1 %v4116_v55 }
 0x21d   :  { %2762 = vmatprep.subr.bf16.mxu1 %v4121_v57 }
 0x220   :  { %2763 = vmatpush2.bf16.msra.mxu1 %v4119_v59 }
 0x221   :  { %2764 = vmatprep.subr.bf16.mxu1 %v4124_v61 }
 0x224   :  { %2765 = vmatpush2.bf16.msra.mxu1 %v4122_v6 }
 0x225   :  { %2766 = vmatprep.subr.bf16.mxu1 %v4127_v4 }
 0x228   :  { %2767 = vmatpush2.bf16.msra.mxu1 %v4125_v5 }
 0x229   :  { %3560 = vmatprep.subr.bf16.mxu1 %v4144_v13 }
 0x22b   :  { %2769 = vmatmul.mubr.bf16.vlgmr.msra.gmra.mxu1 %v4423_v19 }
 0x22c   :  { %3561 = vmatpush3.bf16.msra.mxu1 %v4145_v14 }
 0x22d   :  { %3562 = vmatprep.subr.bf16.mxu1 %v4146_v17 }
 0x230   :  { %3563 = vmatpush3.bf16.msra.mxu1 %v4147_v20 }
 0x231   :  { %3564 = vmatprep.subr.bf16.mxu1 %v4148_v23 }
 0x234   :  { %3565 = vmatpush3.bf16.msra.mxu1 %v4149_v24 }
 0x235   :  { %3566 = vmatprep.subr.bf16.mxu1 %v4150_v25 }
 0x238   :  { %3567 = vmatpush3.bf16.msra.mxu1 %v4151_v26 }
 0x239   :  { %3568 = vmatprep.subr.bf16.mxu1 %v4152_v27 }
 0x23c   :  { %3569 = vmatpush3.bf16.msra.mxu1 %v4153_v28 }
 0x23d   :  { %3570 = vmatprep.subr.bf16.mxu1 %v4154_v18 }
 0x240   :  { %3571 = vmatpush3.bf16.msra.mxu1 %v4155_v1 }
 0x241   :  { %3572 = vmatprep.subr.bf16.mxu1 %v4156_v30 }
 0x244   :  { %3573 = vmatpush3.bf16.msra.mxu1 %v4157_v31 }
 0x245   :  { %3574 = vmatprep.subr.bf16.mxu1 %v4158_v32 }
 0x248   :  { %3575 = vmatpush3.bf16.msra.mxu1 %v4159_v33 }
 0x24a   :  { %v2647_v19 = vpop.f32.mrf.mxu0 }
 0x24b   :  { %v2648_v39 = vadd.f32 %v2647_v19, %v1956_v16 }
 0x24c   :  { %v2649_v21 = vpop.f32.mrf.mxu0 }
 0x24d   :  { %v2650_v41 = vadd.f32 %v2649_v21, %v1960_v38 }
 0x24e   :  { %v2651_v22 = vpop.f32.mrf.mxu0 }
 0x250   :  { %v2652_v29 = vpop.f32.mrf.mxu0 }
 0x28a   :  { %v2729_v7 = vpop.f32.mrf.mxu0 }
 0x28b   :  { %v2730_v53 = vadd.f32 %v2729_v7, %v1964_v0 }
 0x28c   :  { %v2731_v51 = vpop.f32.mrf.mxu0 }
 0x28d   :  { %v2732_v55 = vadd.f32 %v2731_v51, %v1968_v2 }
 0x28e   :  { %v2733_v34 = vpop.f32.mrf.mxu0 }
 0x290   :  { %v2734_v36 = vpop.f32.mrf.mxu0 }
 0x2ab   :  { %v2688_v40 = vpop.f32.mrf.mxu1 }
 0x2ac   :  { %v2689_v42 = vadd.f32 %v2688_v40, %v2648_v39 }
 0x2ad   :  { %v2690_v43 = vpop.f32.mrf.mxu1 }
 0x2ae   :  { %v2691_v44 = vadd.f32 %v2690_v43, %v2650_v41  ;;  %v2777_v45 = vmax.f32 %v2689_v42, 0.0 }
 0x2af   :  { %v2692_v46 = vpop.f32.mrf.mxu1 }
 0x2b0   :  { %v2778_v48 = vmax.f32 %v2691_v44, 0.0  ;;  %v2781_v52 = vpack.c.bf16 %v2777_v45, %v2777_v45 }
 0x2b1   :  { %v2693_v49 = vpop.f32.mrf.mxu1 }
 0x2b2   :  { %v2782_v50 = vpack.c.bf16 %v2778_v48, %v2778_v48 }
 0x2b4   :  { %3080 = vmatprep.mubr.bf16.mxu0 %v2782_v50 }
 0x2b5   :  { %3081 = vmatmul.mubr.bf16.vlgmr.msra.gmra.mxu0 %v2781_v52 }
 0x2eb   :  { %v2770_v54 = vpop.f32.mrf.mxu1 }
 0x2ec   :  { %v2771_v56 = vadd.f32 %v2770_v54, %v2730_v53 }
 0x2ed   :  { %v2772_v57 = vpop.f32.mrf.mxu1 }
 0x2ee   :  { %v2773_v58 = vadd.f32 %v2772_v57, %v2732_v55  ;;  %v2779_v59 = vmax.f32 %v2771_v56, 0.0 }
 0x2ef   :  { %v2774_v60 = vpop.f32.mrf.mxu1 }
 0x2f0   :  { %v2780_v61 = vmax.f32 %v2773_v58, 0.0  ;;  %v2783_v3 = vpack.c.bf16 %v2779_v59, %v2779_v59 }
 0x2f1   :  { %v2775_v15 = vpop.f32.mrf.mxu1 }
 0x2f2   :  { %v2784_v6 = vpack.c.bf16 %v2780_v61, %v2780_v61 }
 0x2f4   :  { %3120 = vmatprep.mubr.bf16.mxu1 %v2784_v6 }
 0x2f5   :  { %3121 = vmatmul.mubr.bf16.vlgmr.msra.gmra.mxu1 %v2783_v3 }
 0x375   :  { %v3554_v4 = vpop.f32.mrf.mxu0 }
 0x377   :  { %v3555_v35 = vpop.f32.mrf.mxu0 }
 0x378   :  { %v3556_v63 = vadd.f32 %v3555_v35, %v3554_v4 }
 0x379   :  { %v3557_v62 = vpop.f32.mrf.mxu0 }
 0x37a   :  { %v3083_v10 = vadd.f32 %v3556_v63, %v3505_v47 }
 0x37b   :  { %v3558_v5 = vpop.f32.mrf.mxu0 }
 0x3b5   :  { %v3576_v8 = vpop.f32.mrf.mxu1 }
 0x3b7   :  { %v3577_v9 = vpop.f32.mrf.mxu1 }
 0x3b8   :  { %v3578_v11 = vadd.f32 %v3577_v9, %v3576_v8 }
 0x3b9   :  { %v3579_v12 = vpop.f32.mrf.mxu1 }
 0x3ba   :  { %v3123_v13 = vadd.f32 %v3578_v11, %v3083_v10 }
 0x3bb   :  { %v3580_v14 = vpop.f32.mrf.mxu1 }
 0x3bc   :  { %3128 = vst [vmem:[#allocation11] sm:$0xff] %v3123_v13 }
 0x3bd   :  { %4272 = shalt.err (!%p4269_p1)
}
 0x3be   :  { %3138 = dma.vmem_to_hbm [thread:$0]  %s3136_s29, 128, %s4451_s7, [#allocation4]  }
 0x3bf   :  { %4287 = dma.done.wait [#allocation4], 128  }
 0x3c0   :  { %4288 = vsyncadd [#allocation4], 4294967168 }
 0x3c1   :  { %3142 = vsyncpa [#allocation3], 1 }
 0x3c2   :  { %3143 = vsyncpa [#allocation6], 1 }
 0x3c3   :  { %3144 = vsyncpa [#allocation9], 1 }
 0x3c4   :  { %3145 = vsyncpa [#allocation4], 1 }

</bundles_post_ra>
